<compile_context>
chip_gen: v7x
topology: tpu7x:2x2x1
jax: 0.10.0
libtpu: 0.0.40
codegen_flags: <defaults>
</compile_context>

<pallas_src>
import math
import numpy as np
import jax
import jax.numpy as jnp
from jax import lax
from jax.experimental import pallas as pl
from jax.experimental.pallas import tpu as pltpu

# ---- synthetic equation constants -------------------------------------------------
DIM_X, DIM_Y, DIM_D = 4, 2, 1
DIM_H = 32
T_FINAL = 1.0
MU, SIGMA0, R, LAM, KX = 0.05, 0.2, 0.03, 0.1, 0.02
X0_VAL = 1.0
LANE = 128


def make_milstein_forward(batch_pad: int, N: int, dim_h: int = DIM_H,
                          use_bf16_matmul: bool = True):
    """batch_pad must be a multiple of 128 (lane-dense batch axis)."""
    assert batch_pad % LANE == 0
    dt = T_FINAL / N
    n_pad = ((N + 7) // 8) * 8          # noise rows padded to a sublane multiple

    # ---- tile selection: cap at 512 lanes, prefer >=2 tiles (v7x dual TensorCore),
    #      cap the per-tile noise slab at 4 MiB (it is double-buffered by the pipeline).
    tile = LANE
    for cand in (512, 256, 128):
        if batch_pad % cand:
            continue
        if cand > LANE and batch_pad < 2 * cand:
            continue                    # keep >= 2 tiles unless forced to the 128 floor
        if cand > LANE and n_pad * cand * 4 > (4 << 20):
            continue                    # noise-slab VMEM cap
        tile = cand
        break
    num_tiles = batch_pad // cand if False else batch_pad // tile

    # ---- unroll tied to tile size: big tiles => less unroll (avoid vreg spills)
    if tile <= 256:
        unroll = True if N <= 16 else 8
    else:
        unroll = True if N <= 4 else 4

    mm_dtype = jnp.bfloat16 if use_bf16_matmul else jnp.float32
    kx_over_dx = KX / DIM_X

    def kernel(noise_ref, x0_ref, y0_ref, w1x_ref, w1t_ref, b1_ref,
               w2_ref, b2_ref, w3_ref, b3_ref, x_ref, y_ref):
        # ---- hoist loop-invariant loads / casts / broadcasts out of the time loop
        w1x = w1x_ref[...].astype(mm_dtype)                     # (H, Dx)
        w2 = w2_ref[...].astype(mm_dtype)                       # (H, H)
        w3 = w3_ref[...].astype(mm_dtype)                       # (Dy, H)
        w1t = w1t_ref[...]                                      # (H, 1) time column (f32)
        b1 = b1_ref[...]                                        # (H, 1)
        b2_b = jnp.broadcast_to(b2_ref[...], (dim_h, tile))     # hoisted lane-broadcast
        b3_b = jnp.broadcast_to(b3_ref[...], (DIM_Y, tile))     # hoisted lane-broadcast
        dt_f = jnp.float32(dt)
        kx_c = jnp.float32(kx_over_dx)

        def body(i, carry):
            x, y = carry                                        # (Dx, Bt), (Dy, Bt) f32
            t = jnp.asarray(i, jnp.float32) * dt_f

            # phi(u), u = concat([x, t*1]) folded into the first matmul:
            #   W1 @ u == W1[:, :Dx] @ x + t * W1[:, Dx]
            # single (H,1)->(H,Bt) broadcast per layer per step.
            b1_step = b1 + t * w1t                              # (H, 1)
            h1 = jnp.maximum(
                jnp.dot(w1x, x.astype(mm_dtype),
                        preferred_element_type=jnp.float32) + b1_step, 0.0)
            h2 = jnp.maximum(
                jnp.dot(w2, h1.astype(mm_dtype),
                        preferred_element_type=jnp.float32) + b2_b, 0.0)
            z = jnp.dot(w3, h2.astype(mm_dtype),
                        preferred_element_type=jnp.float32) + b3_b       # (Dy, Bt)

            # one explicit sublane-broadcast of the Brownian increment per step
            w_row = noise_ref[pl.ds(i, 1), :]                   # (1, Bt)
            w_x = jnp.broadcast_to(w_row, (DIM_X, tile))        # (Dx, Bt)
            w_y = w_x[:DIM_Y]                                   # (Dy, Bt)

            # SDE step (Milstein); dim_d == 1 so matmul(sigma, w) == sigma * w
            sig = SIGMA0 * x                                    # sigma(t, x)
            milstein = (0.5 * SIGMA0) * sig * (w_x * w_x - dt_f)
            x_new = x + (MU * dt_f) * x + sig * w_x + milstein

            # BSDE step: f uses the updated x (matches torch code ordering);
            # mean over features folded into sum * (KX/DIM_X).
            f_val = R * y + LAM * z + kx_c * jnp.sum(x_new, axis=0, keepdims=True)
            y_new = y - f_val * dt_f + z * w_y                  # matmul(z, w) == z * w
            return x_new, y_new

        x_fin, y_fin = lax.fori_loop(0, N, body, (x0_ref[...], y0_ref[...]),
                                     unroll=unroll)
        # single full-width lane-dense stores
        x_ref[...] = x_fin
        y_ref[...] = y_fin

    grid_spec = pltpu.PrefetchScalarGridSpec(
        num_scalar_prefetch=0,
        grid=(num_tiles,),
        in_specs=[
            # noise pre-tiled on host: shape (num_tiles * n_pad, tile); each grid step
            # gets a fully contiguous (n_pad, tile) slab.
            pl.BlockSpec((n_pad, tile), lambda j: (j, 0)),
            pl.BlockSpec((DIM_X, tile), lambda j: (0, j)),             # x init
            pl.BlockSpec((DIM_Y, tile), lambda j: (0, j)),             # y init
            pl.BlockSpec((dim_h, DIM_X), lambda j: (0, 0)),            # W1[:, :Dx]
            pl.BlockSpec((dim_h, 1), lambda j: (0, 0)),                # W1[:, Dx] (time col)
            pl.BlockSpec((dim_h, 1), lambda j: (0, 0)),                # b1
            pl.BlockSpec((dim_h, dim_h), lambda j: (0, 0)),            # W2
            pl.BlockSpec((dim_h, 1), lambda j: (0, 0)),                # b2
            pl.BlockSpec((DIM_Y * DIM_D, dim_h), lambda j: (0, 0)),    # W3
            pl.BlockSpec((DIM_Y * DIM_D, 1), lambda j: (0, 0)),        # b3
        ],
        out_specs=[
            pl.BlockSpec((DIM_X, tile), lambda j: (0, j)),
            pl.BlockSpec((DIM_Y, tile), lambda j: (0, j)),
        ],
    )

    # explicit VMEM budget: double-buffered noise + state blocks + weights + headroom,
    # clamped so it fits every generation's scoped default (v5e 16 MiB, v7x 32 MiB).
    noise_block_bytes = n_pad * tile * 4
    state_block_bytes = (DIM_X + DIM_Y) * tile * 4
    weight_bytes = 4 * (dim_h * (DIM_X + 2) + dim_h * dim_h + dim_h
                        + DIM_Y * dim_h + DIM_Y)
    need = 2 * (noise_block_bytes + 2 * state_block_bytes) + 2 * weight_bytes + (8 << 20)
    vmem_limit = int(min(max(need, 16 << 20), 32 << 20))

    mm_flops = 2 * (dim_h * (DIM_X + 1) + dim_h * dim_h + DIM_Y * DIM_D * dim_h)
    cost = pl.CostEstimate(
        flops=int(N * batch_pad * (mm_flops + 40)),
        transcendentals=0,
        bytes_accessed=int(4 * (num_tiles * n_pad * tile
                                + 2 * (DIM_X + DIM_Y) * batch_pad) + weight_bytes),
    )

    fwd = pl.pallas_call(
        kernel,
        out_shape=(jax.ShapeDtypeStruct((DIM_X, batch_pad), jnp.float32),
                   jax.ShapeDtypeStruct((DIM_Y, batch_pad), jnp.float32)),
        grid_spec=grid_spec,
        compiler_params=pltpu.CompilerParams(
            # TODO(synk): on v7x consider pltpu.CORE_PARALLEL here so the batch-tile axis
            # shards across the two TensorCores.
            dimension_semantics=(pltpu.PARALLEL,),
            vmem_limit_bytes=vmem_limit,
        ),
        cost_estimate=cost,
    )
    meta = dict(tile=tile, num_tiles=num_tiles, n_pad=n_pad, dt=dt, unroll=unroll)
    return fwd, meta


if __name__ == "__main__":
    B, N = 8, 8
    key = jax.random.PRNGKey(0)
    keys = jax.random.split(key, 6)

    # deterministic parameter init (PyTorch nn.Linear-style uniform bounds)
    def lin_init(k, out_d, in_d):
        bound = 1.0 / math.sqrt(in_d)
        kw, kb = jax.random.split(k)
        W = jax.random.uniform(kw, (out_d, in_d), jnp.float32, -bound, bound)
        b = jax.random.uniform(kb, (out_d,), jnp.float32, -bound, bound)
        return W, b

    W1, b1 = lin_init(keys[0], DIM_H, DIM_X + 1)
    W2, b2 = lin_init(keys[1], DIM_H, DIM_H)
    W3, b3 = lin_init(keys[2], DIM_Y * DIM_D, DIM_H)
    y0_param = jax.random.uniform(keys[3], (DIM_Y,), jnp.float32)

    dt = T_FINAL / N
    # torch layout: (B, dim_d, N). The torch module draws the noise internally; here it is
    # precomputed deterministically and fed to the kernel.
    Wn = jax.random.normal(keys[4], (B, DIM_D, N), jnp.float32) * math.sqrt(dt)

    B_pad = ((B + LANE - 1) // LANE) * LANE
    fwd, meta = make_milstein_forward(B_pad, N)
    tile, num_tiles, n_pad = meta["tile"], meta["num_tiles"], meta["n_pad"]

    # noise pre-tiled on host: time-major lane-dense, contiguous per batch tile
    W_tb = np.asarray(jnp.transpose(Wn[:, 0, :], (1, 0)))          # (N, B)
    full = np.zeros((n_pad, B_pad), np.float32)
    full[:N, :B] = W_tb
    noise = jnp.asarray(
        full.reshape(n_pad, num_tiles, tile).transpose(1, 0, 2)
            .reshape(num_tiles * n_pad, tile))

    # feature-major (feature, batch) state so batch sits on the 128-lane axis
    x0 = jnp.full((DIM_X, B_pad), X0_VAL, jnp.float32)
    y0 = jnp.broadcast_to(y0_param[:, None], (DIM_Y, B_pad)).astype(jnp.float32)

    w1x = W1[:, :DIM_X]                 # (H, Dx)
    w1t = W1[:, DIM_X:DIM_X + 1]        # (H, 1)

    x_out_p, y_out_p = fwd(noise, x0, y0, w1x, w1t, b1[:, None],
                           W2, b2[:, None], W3, b3[:, None])
    jax.block_until_ready((x_out_p, y_out_p))

    # back to torch-style (B, feature) layout, dropping the batch padding
    x_out = jnp.transpose(x_out_p[:, :B])
    y_out = jnp.transpose(y_out_p[:, :B])

    # pure-JAX f32 reference of the same forward (batch-major, like the torch module)
    def ref():
        x = jnp.full((B, DIM_X), X0_VAL, jnp.float32)
        y = jnp.broadcast_to(y0_param, (B, DIM_Y)).astype(jnp.float32)
        for i in range(N):
            t = i * dt
            u = jnp.concatenate([x, jnp.full((B, 1), t, jnp.float32)], axis=1)
            h1 = jax.nn.relu(u @ W1.T + b1)
            h2 = jax.nn.relu(h1 @ W2.T + b2)
            z = h2 @ W3.T + b3                      # (B, dim_y) since dim_d == 1
            w = Wn[:, :, i]                         # (B, dim_d)
            sig = SIGMA0 * x
            milstein = 0.5 * SIGMA0 * sig * (w * w - dt)
            x = x + MU * x * dt + sig * w + milstein
            f_val = R * y + LAM * z + KX * jnp.mean(x, axis=-1, keepdims=True)
            y = y - f_val * dt + z * w
        return x, y

    xr, yr = ref()
    # x never flows through a matmul -> f32-exact vs the reference.
    assert np.allclose(np.asarray(x_out), np.asarray(xr), rtol=1e-4, atol=1e-4)
    # y depends on z from bf16-input MXU matmuls (per perf review); tolerance reflects
    # the ~1e-3-level bf16 rounding compounded over N steps.
    assert np.allclose(np.asarray(y_out), np.asarray(yr), rtol=1e-2, atol=2e-2)
    print("KERNEL_OK")
</pallas_src>

<mosaic_0001>
module attributes {stable_mosaic.version = 11 : i64} {
  func.func @kernel(%arg0: i32, %arg1: memref<8x128xf32, #tpu.memory_space<vmem>>, %arg2: memref<4x128xf32, #tpu.memory_space<vmem>>, %arg3: memref<2x128xf32, #tpu.memory_space<vmem>>, %arg4: memref<32x4xf32, #tpu.memory_space<vmem>>, %arg5: memref<32x1xf32, #tpu.memory_space<vmem>>, %arg6: memref<32x1xf32, #tpu.memory_space<vmem>>, %arg7: memref<32x32xf32, #tpu.memory_space<vmem>>, %arg8: memref<32x1xf32, #tpu.memory_space<vmem>>, %arg9: memref<2x32xf32, #tpu.memory_space<vmem>>, %arg10: memref<2x1xf32, #tpu.memory_space<vmem>>, %arg11: memref<4x128xf32, #tpu.memory_space<vmem>>, %arg12: memref<2x128xf32, #tpu.memory_space<vmem>>) attributes {dimension_semantics = [#tpu.dimension_semantics<parallel>], iteration_bounds = array<i64: 1>, scalar_prefetch = 0 : i64, scratch_operands = 0 : i64, tpu.core_type = #tpu.core_type<tc>, window_params = [{transform_indices = @transform_0, window_bounds = array<i64: 8, 128>}, {transform_indices = @transform_1, window_bounds = array<i64: 4, 128>}, {transform_indices = @transform_2, window_bounds = array<i64: 2, 128>}, {pipeline_mode = #tpu.pipeline_mode<synchronous>, transform_indices = @transform_3, window_bounds = array<i64: 32, 4>}, {pipeline_mode = #tpu.pipeline_mode<synchronous>, transform_indices = @transform_4, window_bounds = array<i64: 32, 1>}, {pipeline_mode = #tpu.pipeline_mode<synchronous>, transform_indices = @transform_5, window_bounds = array<i64: 32, 1>}, {pipeline_mode = #tpu.pipeline_mode<synchronous>, transform_indices = @transform_6, window_bounds = array<i64: 32, 32>}, {pipeline_mode = #tpu.pipeline_mode<synchronous>, transform_indices = @transform_7, window_bounds = array<i64: 32, 1>}, {pipeline_mode = #tpu.pipeline_mode<synchronous>, transform_indices = @transform_8, window_bounds = array<i64: 2, 32>}, {pipeline_mode = #tpu.pipeline_mode<synchronous>, transform_indices = @transform_9, window_bounds = array<i64: 2, 1>}, {transform_indices = @transform_10, window_bounds = array<i64: 4, 128>}, {transform_indices = @transform_11, window_bounds = array<i64: 2, 128>}]} {
    %c0 = arith.constant 0 : index
    %c0_0 = arith.constant 0 : index
    %0 = vector.load %arg4[%c0, %c0_0] : memref<32x4xf32, #tpu.memory_space<vmem>>, vector<32x4xf32>
    %1 = arith.truncf %0 : vector<32x4xf32> to vector<32x4xbf16>
    %c0_1 = arith.constant 0 : index
    %c0_2 = arith.constant 0 : index
    %2 = vector.load %arg7[%c0_1, %c0_2] : memref<32x32xf32, #tpu.memory_space<vmem>>, vector<32x32xf32>
    %3 = arith.truncf %2 : vector<32x32xf32> to vector<32x32xbf16>
    %c0_3 = arith.constant 0 : index
    %c0_4 = arith.constant 0 : index
    %4 = vector.load %arg9[%c0_3, %c0_4] : memref<2x32xf32, #tpu.memory_space<vmem>>, vector<2x32xf32>
    %5 = arith.truncf %4 : vector<2x32xf32> to vector<2x32xbf16>
    %c0_5 = arith.constant 0 : index
    %c0_6 = arith.constant 0 : index
    %6 = vector.load %arg5[%c0_5, %c0_6] : memref<32x1xf32, #tpu.memory_space<vmem>>, vector<32x1xf32>
    %c0_7 = arith.constant 0 : index
    %c0_8 = arith.constant 0 : index
    %7 = vector.load %arg6[%c0_7, %c0_8] : memref<32x1xf32, #tpu.memory_space<vmem>>, vector<32x1xf32>
    %c0_9 = arith.constant 0 : index
    %c0_10 = arith.constant 0 : index
    %8 = vector.load %arg8[%c0_9, %c0_10] : memref<32x1xf32, #tpu.memory_space<vmem>>, vector<32x1xf32>
    %9 = vector.shape_cast %8 : vector<32x1xf32> to vector<32x1xf32>
    %10 = vector.broadcast %9 : vector<32x1xf32> to vector<32x128xf32>
    %c0_11 = arith.constant 0 : index
    %c0_12 = arith.constant 0 : index
    %11 = vector.load %arg10[%c0_11, %c0_12] : memref<2x1xf32, #tpu.memory_space<vmem>>, vector<2x1xf32>
    %12 = vector.shape_cast %11 : vector<2x1xf32> to vector<2x1xf32>
    %13 = vector.broadcast %12 : vector<2x1xf32> to vector<2x128xf32>
    %c0_13 = arith.constant 0 : index
    %c0_14 = arith.constant 0 : index
    %14 = vector.load %arg2[%c0_13, %c0_14] : memref<4x128xf32, #tpu.memory_space<vmem>>, vector<4x128xf32>
    %c0_15 = arith.constant 0 : index
    %c0_16 = arith.constant 0 : index
    %15 = vector.load %arg3[%c0_15, %c0_16] : memref<2x128xf32, #tpu.memory_space<vmem>>, vector<2x128xf32>
    %cst = arith.constant 1.250000e-01 : f32
    %cst_17 = arith.constant 5.000000e-03 : f32
    %c0_i32 = arith.constant 0 : i32
    %16 = arith.sitofp %c0_i32 : i32 to f32
    %17 = arith.mulf %16, %cst : f32
    %18 = vector.broadcast %17 : f32 to vector<32x1xf32>
    %19 = arith.mulf %18, %6 : vector<32x1xf32>
    %20 = arith.addf %7, %19 : vector<32x1xf32>
    %21 = arith.truncf %14 : vector<4x128xf32> to vector<4x128xbf16>
    %cst_18 = arith.constant dense<0.000000e+00> : vector<32x128xf32>
    %22 = tpu.matmul %1, %21, %cst_18 {dimension_numbers = #tpu.dot_dimension_numbers<[1], [0], [0], [1], [0, 0, 1, 1], [], []>} : vector<32x4xbf16>, vector<4x128xbf16>, vector<32x128xf32> -> vector<32x128xf32>
    %23 = vector.broadcast %20 : vector<32x1xf32> to vector<32x128xf32>
    %24 = arith.addf %22, %23 : vector<32x128xf32>
    %cst_19 = arith.constant 0.000000e+00 : f32
    %25 = vector.broadcast %cst_19 : f32 to vector<32x128xf32>
    %26 = arith.maximumf %24, %25 : vector<32x128xf32>
    %27 = arith.truncf %26 : vector<32x128xf32> to vector<32x128xbf16>
    %cst_20 = arith.constant dense<0.000000e+00> : vector<32x128xf32>
    %28 = tpu.matmul %3, %27, %cst_20 {dimension_numbers = #tpu.dot_dimension_numbers<[1], [0], [0], [1], [0, 0, 1, 1], [], []>} : vector<32x32xbf16>, vector<32x128xbf16>, vector<32x128xf32> -> vector<32x128xf32>
    %29 = arith.addf %28, %10 : vector<32x128xf32>
    %cst_21 = arith.constant 0.000000e+00 : f32
    %30 = vector.broadcast %cst_21 : f32 to vector<32x128xf32>
    %31 = arith.maximumf %29, %30 : vector<32x128xf32>
    %32 = arith.truncf %31 : vector<32x128xf32> to vector<32x128xbf16>
    %cst_22 = arith.constant dense<0.000000e+00> : vector<2x128xf32>
    %33 = tpu.matmul %5, %32, %cst_22 {dimension_numbers = #tpu.dot_dimension_numbers<[1], [0], [0], [1], [0, 0, 1, 1], [], []>} : vector<2x32xbf16>, vector<32x128xbf16>, vector<2x128xf32> -> vector<2x128xf32>
    %34 = arith.addf %33, %13 : vector<2x128xf32>
    %35 = arith.index_cast %c0_i32 : i32 to index
    %c0_23 = arith.constant 0 : index
    %36 = vector.load %arg1[%35, %c0_23] : memref<8x128xf32, #tpu.memory_space<vmem>>, vector<1x128xf32>
    %37 = vector.shape_cast %36 : vector<1x128xf32> to vector<1x128xf32>
    %38 = vector.broadcast %37 : vector<1x128xf32> to vector<4x128xf32>
    %39 = vector.extract_strided_slice %38 {offsets = [0, 0], sizes = [2, 128], strides = [1, 1]} : vector<4x128xf32> to vector<2x128xf32>
    %cst_24 = arith.constant 2.000000e-01 : f32
    %40 = vector.broadcast %cst_24 : f32 to vector<4x128xf32>
    %41 = arith.mulf %40, %14 : vector<4x128xf32>
    %cst_25 = arith.constant 1.000000e-01 : f32
    %42 = vector.broadcast %cst_25 : f32 to vector<4x128xf32>
    %43 = arith.mulf %42, %41 : vector<4x128xf32>
    %44 = arith.mulf %38, %38 : vector<4x128xf32>
    %45 = vector.broadcast %cst : f32 to vector<4x128xf32>
    %46 = arith.subf %44, %45 : vector<4x128xf32>
    %47 = arith.mulf %43, %46 : vector<4x128xf32>
    %cst_26 = arith.constant 5.000000e-02 : f32
    %48 = arith.mulf %cst_26, %cst : f32
    %49 = vector.broadcast %48 : f32 to vector<4x128xf32>
    %50 = arith.mulf %49, %14 : vector<4x128xf32>
    %51 = arith.addf %14, %50 : vector<4x128xf32>
    %52 = arith.mulf %41, %38 : vector<4x128xf32>
    %53 = arith.addf %51, %52 : vector<4x128xf32>
    %54 = arith.addf %53, %47 : vector<4x128xf32>
    %cst_27 = arith.constant 3.000000e-02 : f32
    %55 = vector.broadcast %cst_27 : f32 to vector<2x128xf32>
    %56 = arith.mulf %55, %15 : vector<2x128xf32>
    %cst_28 = arith.constant 1.000000e-01 : f32
    %57 = vector.broadcast %cst_28 : f32 to vector<2x128xf32>
    %58 = arith.mulf %57, %34 : vector<2x128xf32>
    %59 = arith.addf %56, %58 : vector<2x128xf32>
    %cst_29 = arith.constant dense<0.000000e+00> : vector<128xf32>
    %60 = vector.multi_reduction <add>, %54, %cst_29 [0] : vector<4x128xf32> to vector<128xf32>
    %61 = vector.shape_cast %60 : vector<128xf32> to vector<1x128xf32>
    %62 = vector.broadcast %cst_17 : f32 to vector<1x128xf32>
    %63 = arith.mulf %62, %61 : vector<1x128xf32>
    %64 = vector.broadcast %63 : vector<1x128xf32> to vector<2x128xf32>
    %65 = arith.addf %59, %64 : vector<2x128xf32>
    %66 = vector.broadcast %cst : f32 to vector<2x128xf32>
    %67 = arith.mulf %65, %66 : vector<2x128xf32>
    %68 = arith.subf %15, %67 : vector<2x128xf32>
    %69 = arith.mulf %34, %39 : vector<2x128xf32>
    %70 = arith.addf %68, %69 : vector<2x128xf32>
    %c1_i32 = arith.constant 1 : i32
    %71 = arith.sitofp %c1_i32 : i32 to f32
    %72 = arith.mulf %71, %cst : f32
    %73 = vector.broadcast %72 : f32 to vector<32x1xf32>
    %74 = arith.mulf %73, %6 : vector<32x1xf32>
    %75 = arith.addf %7, %74 : vector<32x1xf32>
    %76 = arith.truncf %54 : vector<4x128xf32> to vector<4x128xbf16>
    %cst_30 = arith.constant dense<0.000000e+00> : vector<32x128xf32>
    %77 = tpu.matmul %1, %76, %cst_30 {dimension_numbers = #tpu.dot_dimension_numbers<[1], [0], [0], [1], [0, 0, 1, 1], [], []>} : vector<32x4xbf16>, vector<4x128xbf16>, vector<32x128xf32> -> vector<32x128xf32>
    %78 = vector.broadcast %75 : vector<32x1xf32> to vector<32x128xf32>
    %79 = arith.addf %77, %78 : vector<32x128xf32>
    %cst_31 = arith.constant 0.000000e+00 : f32
    %80 = vector.broadcast %cst_31 : f32 to vector<32x128xf32>
    %81 = arith.maximumf %79, %80 : vector<32x128xf32>
    %82 = arith.truncf %81 : vector<32x128xf32> to vector<32x128xbf16>
    %cst_32 = arith.constant dense<0.000000e+00> : vector<32x128xf32>
    %83 = tpu.matmul %3, %82, %cst_32 {dimension_numbers = #tpu.dot_dimension_numbers<[1], [0], [0], [1], [0, 0, 1, 1], [], []>} : vector<32x32xbf16>, vector<32x128xbf16>, vector<32x128xf32> -> vector<32x128xf32>
    %84 = arith.addf %83, %10 : vector<32x128xf32>
    %cst_33 = arith.constant 0.000000e+00 : f32
    %85 = vector.broadcast %cst_33 : f32 to vector<32x128xf32>
    %86 = arith.maximumf %84, %85 : vector<32x128xf32>
    %87 = arith.truncf %86 : vector<32x128xf32> to vector<32x128xbf16>
    %cst_34 = arith.constant dense<0.000000e+00> : vector<2x128xf32>
    %88 = tpu.matmul %5, %87, %cst_34 {dimension_numbers = #tpu.dot_dimension_numbers<[1], [0], [0], [1], [0, 0, 1, 1], [], []>} : vector<2x32xbf16>, vector<32x128xbf16>, vector<2x128xf32> -> vector<2x128xf32>
    %89 = arith.addf %88, %13 : vector<2x128xf32>
    %90 = arith.index_cast %c1_i32 : i32 to index
    %c0_35 = arith.constant 0 : index
    %91 = vector.load %arg1[%90, %c0_35] : memref<8x128xf32, #tpu.memory_space<vmem>>, vector<1x128xf32>
    %92 = vector.shape_cast %91 : vector<1x128xf32> to vector<1x128xf32>
    %93 = vector.broadcast %92 : vector<1x128xf32> to vector<4x128xf32>
    %94 = vector.extract_strided_slice %93 {offsets = [0, 0], sizes = [2, 128], strides = [1, 1]} : vector<4x128xf32> to vector<2x128xf32>
    %cst_36 = arith.constant 2.000000e-01 : f32
    %95 = vector.broadcast %cst_36 : f32 to vector<4x128xf32>
    %96 = arith.mulf %95, %54 : vector<4x128xf32>
    %cst_37 = arith.constant 1.000000e-01 : f32
    %97 = vector.broadcast %cst_37 : f32 to vector<4x128xf32>
    %98 = arith.mulf %97, %96 : vector<4x128xf32>
    %99 = arith.mulf %93, %93 : vector<4x128xf32>
    %100 = vector.broadcast %cst : f32 to vector<4x128xf32>
    %101 = arith.subf %99, %100 : vector<4x128xf32>
    %102 = arith.mulf %98, %101 : vector<4x128xf32>
    %cst_38 = arith.constant 5.000000e-02 : f32
    %103 = arith.mulf %cst_38, %cst : f32
    %104 = vector.broadcast %103 : f32 to vector<4x128xf32>
    %105 = arith.mulf %104, %54 : vector<4x128xf32>
    %106 = arith.addf %54, %105 : vector<4x128xf32>
    %107 = arith.mulf %96, %93 : vector<4x128xf32>
    %108 = arith.addf %106, %107 : vector<4x128xf32>
    %109 = arith.addf %108, %102 : vector<4x128xf32>
    %cst_39 = arith.constant 3.000000e-02 : f32
    %110 = vector.broadcast %cst_39 : f32 to vector<2x128xf32>
    %111 = arith.mulf %110, %70 : vector<2x128xf32>
    %cst_40 = arith.constant 1.000000e-01 : f32
    %112 = vector.broadcast %cst_40 : f32 to vector<2x128xf32>
    %113 = arith.mulf %112, %89 : vector<2x128xf32>
    %114 = arith.addf %111, %113 : vector<2x128xf32>
    %cst_41 = arith.constant dense<0.000000e+00> : vector<128xf32>
    %115 = vector.multi_reduction <add>, %109, %cst_41 [0] : vector<4x128xf32> to vector<128xf32>
    %116 = vector.shape_cast %115 : vector<128xf32> to vector<1x128xf32>
    %117 = vector.broadcast %cst_17 : f32 to vector<1x128xf32>
    %118 = arith.mulf %117, %116 : vector<1x128xf32>
    %119 = vector.broadcast %118 : vector<1x128xf32> to vector<2x128xf32>
    %120 = arith.addf %114, %119 : vector<2x128xf32>
    %121 = vector.broadcast %cst : f32 to vector<2x128xf32>
    %122 = arith.mulf %120, %121 : vector<2x128xf32>
    %123 = arith.subf %70, %122 : vector<2x128xf32>
    %124 = arith.mulf %89, %94 : vector<2x128xf32>
    %125 = arith.addf %123, %124 : vector<2x128xf32>
    %c2_i32 = arith.constant 2 : i32
    %126 = arith.sitofp %c2_i32 : i32 to f32
    %127 = arith.mulf %126, %cst : f32
    %128 = vector.broadcast %127 : f32 to vector<32x1xf32>
    %129 = arith.mulf %128, %6 : vector<32x1xf32>
    %130 = arith.addf %7, %129 : vector<32x1xf32>
    %131 = arith.truncf %109 : vector<4x128xf32> to vector<4x128xbf16>
    %cst_42 = arith.constant dense<0.000000e+00> : vector<32x128xf32>
    %132 = tpu.matmul %1, %131, %cst_42 {dimension_numbers = #tpu.dot_dimension_numbers<[1], [0], [0], [1], [0, 0, 1, 1], [], []>} : vector<32x4xbf16>, vector<4x128xbf16>, vector<32x128xf32> -> vector<32x128xf32>
    %133 = vector.broadcast %130 : vector<32x1xf32> to vector<32x128xf32>
    %134 = arith.addf %132, %133 : vector<32x128xf32>
    %cst_43 = arith.constant 0.000000e+00 : f32
    %135 = vector.broadcast %cst_43 : f32 to vector<32x128xf32>
    %136 = arith.maximumf %134, %135 : vector<32x128xf32>
    %137 = arith.truncf %136 : vector<32x128xf32> to vector<32x128xbf16>
    %cst_44 = arith.constant dense<0.000000e+00> : vector<32x128xf32>
    %138 = tpu.matmul %3, %137, %cst_44 {dimension_numbers = #tpu.dot_dimension_numbers<[1], [0], [0], [1], [0, 0, 1, 1], [], []>} : vector<32x32xbf16>, vector<32x128xbf16>, vector<32x128xf32> -> vector<32x128xf32>
    %139 = arith.addf %138, %10 : vector<32x128xf32>
    %cst_45 = arith.constant 0.000000e+00 : f32
    %140 = vector.broadcast %cst_45 : f32 to vector<32x128xf32>
    %141 = arith.maximumf %139, %140 : vector<32x128xf32>
    %142 = arith.truncf %141 : vector<32x128xf32> to vector<32x128xbf16>
    %cst_46 = arith.constant dense<0.000000e+00> : vector<2x128xf32>
    %143 = tpu.matmul %5, %142, %cst_46 {dimension_numbers = #tpu.dot_dimension_numbers<[1], [0], [0], [1], [0, 0, 1, 1], [], []>} : vector<2x32xbf16>, vector<32x128xbf16>, vector<2x128xf32> -> vector<2x128xf32>
    %144 = arith.addf %143, %13 : vector<2x128xf32>
    %145 = arith.index_cast %c2_i32 : i32 to index
    %c0_47 = arith.constant 0 : index
    %146 = vector.load %arg1[%145, %c0_47] : memref<8x128xf32, #tpu.memory_space<vmem>>, vector<1x128xf32>
    %147 = vector.shape_cast %146 : vector<1x128xf32> to vector<1x128xf32>
    %148 = vector.broadcast %147 : vector<1x128xf32> to vector<4x128xf32>
    %149 = vector.extract_strided_slice %148 {offsets = [0, 0], sizes = [2, 128], strides = [1, 1]} : vector<4x128xf32> to vector<2x128xf32>
    %cst_48 = arith.constant 2.000000e-01 : f32
    %150 = vector.broadcast %cst_48 : f32 to vector<4x128xf32>
    %151 = arith.mulf %150, %109 : vector<4x128xf32>
    %cst_49 = arith.constant 1.000000e-01 : f32
    %152 = vector.broadcast %cst_49 : f32 to vector<4x128xf32>
    %153 = arith.mulf %152, %151 : vector<4x128xf32>
    %154 = arith.mulf %148, %148 : vector<4x128xf32>
    %155 = vector.broadcast %cst : f32 to vector<4x128xf32>
    %156 = arith.subf %154, %155 : vector<4x128xf32>
    %157 = arith.mulf %153, %156 : vector<4x128xf32>
    %cst_50 = arith.constant 5.000000e-02 : f32
    %158 = arith.mulf %cst_50, %cst : f32
    %159 = vector.broadcast %158 : f32 to vector<4x128xf32>
    %160 = arith.mulf %159, %109 : vector<4x128xf32>
    %161 = arith.addf %109, %160 : vector<4x128xf32>
    %162 = arith.mulf %151, %148 : vector<4x128xf32>
    %163 = arith.addf %161, %162 : vector<4x128xf32>
    %164 = arith.addf %163, %157 : vector<4x128xf32>
    %cst_51 = arith.constant 3.000000e-02 : f32
    %165 = vector.broadcast %cst_51 : f32 to vector<2x128xf32>
    %166 = arith.mulf %165, %125 : vector<2x128xf32>
    %cst_52 = arith.constant 1.000000e-01 : f32
    %167 = vector.broadcast %cst_52 : f32 to vector<2x128xf32>
    %168 = arith.mulf %167, %144 : vector<2x128xf32>
    %169 = arith.addf %166, %168 : vector<2x128xf32>
    %cst_53 = arith.constant dense<0.000000e+00> : vector<128xf32>
    %170 = vector.multi_reduction <add>, %164, %cst_53 [0] : vector<4x128xf32> to vector<128xf32>
    %171 = vector.shape_cast %170 : vector<128xf32> to vector<1x128xf32>
    %172 = vector.broadcast %cst_17 : f32 to vector<1x128xf32>
    %173 = arith.mulf %172, %171 : vector<1x128xf32>
    %174 = vector.broadcast %173 : vector<1x128xf32> to vector<2x128xf32>
    %175 = arith.addf %169, %174 : vector<2x128xf32>
    %176 = vector.broadcast %cst : f32 to vector<2x128xf32>
    %177 = arith.mulf %175, %176 : vector<2x128xf32>
    %178 = arith.subf %125, %177 : vector<2x128xf32>
    %179 = arith.mulf %144, %149 : vector<2x128xf32>
    %180 = arith.addf %178, %179 : vector<2x128xf32>
    %c3_i32 = arith.constant 3 : i32
    %181 = arith.sitofp %c3_i32 : i32 to f32
    %182 = arith.mulf %181, %cst : f32
    %183 = vector.broadcast %182 : f32 to vector<32x1xf32>
    %184 = arith.mulf %183, %6 : vector<32x1xf32>
    %185 = arith.addf %7, %184 : vector<32x1xf32>
    %186 = arith.truncf %164 : vector<4x128xf32> to vector<4x128xbf16>
    %cst_54 = arith.constant dense<0.000000e+00> : vector<32x128xf32>
    %187 = tpu.matmul %1, %186, %cst_54 {dimension_numbers = #tpu.dot_dimension_numbers<[1], [0], [0], [1], [0, 0, 1, 1], [], []>} : vector<32x4xbf16>, vector<4x128xbf16>, vector<32x128xf32> -> vector<32x128xf32>
    %188 = vector.broadcast %185 : vector<32x1xf32> to vector<32x128xf32>
    %189 = arith.addf %187, %188 : vector<32x128xf32>
    %cst_55 = arith.constant 0.000000e+00 : f32
    %190 = vector.broadcast %cst_55 : f32 to vector<32x128xf32>
    %191 = arith.maximumf %189, %190 : vector<32x128xf32>
    %192 = arith.truncf %191 : vector<32x128xf32> to vector<32x128xbf16>
    %cst_56 = arith.constant dense<0.000000e+00> : vector<32x128xf32>
    %193 = tpu.matmul %3, %192, %cst_56 {dimension_numbers = #tpu.dot_dimension_numbers<[1], [0], [0], [1], [0, 0, 1, 1], [], []>} : vector<32x32xbf16>, vector<32x128xbf16>, vector<32x128xf32> -> vector<32x128xf32>
    %194 = arith.addf %193, %10 : vector<32x128xf32>
    %cst_57 = arith.constant 0.000000e+00 : f32
    %195 = vector.broadcast %cst_57 : f32 to vector<32x128xf32>
    %196 = arith.maximumf %194, %195 : vector<32x128xf32>
    %197 = arith.truncf %196 : vector<32x128xf32> to vector<32x128xbf16>
    %cst_58 = arith.constant dense<0.000000e+00> : vector<2x128xf32>
    %198 = tpu.matmul %5, %197, %cst_58 {dimension_numbers = #tpu.dot_dimension_numbers<[1], [0], [0], [1], [0, 0, 1, 1], [], []>} : vector<2x32xbf16>, vector<32x128xbf16>, vector<2x128xf32> -> vector<2x128xf32>
    %199 = arith.addf %198, %13 : vector<2x128xf32>
    %200 = arith.index_cast %c3_i32 : i32 to index
    %c0_59 = arith.constant 0 : index
    %201 = vector.load %arg1[%200, %c0_59] : memref<8x128xf32, #tpu.memory_space<vmem>>, vector<1x128xf32>
    %202 = vector.shape_cast %201 : vector<1x128xf32> to vector<1x128xf32>
    %203 = vector.broadcast %202 : vector<1x128xf32> to vector<4x128xf32>
    %204 = vector.extract_strided_slice %203 {offsets = [0, 0], sizes = [2, 128], strides = [1, 1]} : vector<4x128xf32> to vector<2x128xf32>
    %cst_60 = arith.constant 2.000000e-01 : f32
    %205 = vector.broadcast %cst_60 : f32 to vector<4x128xf32>
    %206 = arith.mulf %205, %164 : vector<4x128xf32>
    %cst_61 = arith.constant 1.000000e-01 : f32
    %207 = vector.broadcast %cst_61 : f32 to vector<4x128xf32>
    %208 = arith.mulf %207, %206 : vector<4x128xf32>
    %209 = arith.mulf %203, %203 : vector<4x128xf32>
    %210 = vector.broadcast %cst : f32 to vector<4x128xf32>
    %211 = arith.subf %209, %210 : vector<4x128xf32>
    %212 = arith.mulf %208, %211 : vector<4x128xf32>
    %cst_62 = arith.constant 5.000000e-02 : f32
    %213 = arith.mulf %cst_62, %cst : f32
    %214 = vector.broadcast %213 : f32 to vector<4x128xf32>
    %215 = arith.mulf %214, %164 : vector<4x128xf32>
    %216 = arith.addf %164, %215 : vector<4x128xf32>
    %217 = arith.mulf %206, %203 : vector<4x128xf32>
    %218 = arith.addf %216, %217 : vector<4x128xf32>
    %219 = arith.addf %218, %212 : vector<4x128xf32>
    %cst_63 = arith.constant 3.000000e-02 : f32
    %220 = vector.broadcast %cst_63 : f32 to vector<2x128xf32>
    %221 = arith.mulf %220, %180 : vector<2x128xf32>
    %cst_64 = arith.constant 1.000000e-01 : f32
    %222 = vector.broadcast %cst_64 : f32 to vector<2x128xf32>
    %223 = arith.mulf %222, %199 : vector<2x128xf32>
    %224 = arith.addf %221, %223 : vector<2x128xf32>
    %cst_65 = arith.constant dense<0.000000e+00> : vector<128xf32>
    %225 = vector.multi_reduction <add>, %219, %cst_65 [0] : vector<4x128xf32> to vector<128xf32>
    %226 = vector.shape_cast %225 : vector<128xf32> to vector<1x128xf32>
    %227 = vector.broadcast %cst_17 : f32 to vector<1x128xf32>
    %228 = arith.mulf %227, %226 : vector<1x128xf32>
    %229 = vector.broadcast %228 : vector<1x128xf32> to vector<2x128xf32>
    %230 = arith.addf %224, %229 : vector<2x128xf32>
    %231 = vector.broadcast %cst : f32 to vector<2x128xf32>
    %232 = arith.mulf %230, %231 : vector<2x128xf32>
    %233 = arith.subf %180, %232 : vector<2x128xf32>
    %234 = arith.mulf %199, %204 : vector<2x128xf32>
    %235 = arith.addf %233, %234 : vector<2x128xf32>
    %c4_i32 = arith.constant 4 : i32
    %236 = arith.sitofp %c4_i32 : i32 to f32
    %237 = arith.mulf %236, %cst : f32
    %238 = vector.broadcast %237 : f32 to vector<32x1xf32>
    %239 = arith.mulf %238, %6 : vector<32x1xf32>
    %240 = arith.addf %7, %239 : vector<32x1xf32>
    %241 = arith.truncf %219 : vector<4x128xf32> to vector<4x128xbf16>
    %cst_66 = arith.constant dense<0.000000e+00> : vector<32x128xf32>
    %242 = tpu.matmul %1, %241, %cst_66 {dimension_numbers = #tpu.dot_dimension_numbers<[1], [0], [0], [1], [0, 0, 1, 1], [], []>} : vector<32x4xbf16>, vector<4x128xbf16>, vector<32x128xf32> -> vector<32x128xf32>
    %243 = vector.broadcast %240 : vector<32x1xf32> to vector<32x128xf32>
    %244 = arith.addf %242, %243 : vector<32x128xf32>
    %cst_67 = arith.constant 0.000000e+00 : f32
    %245 = vector.broadcast %cst_67 : f32 to vector<32x128xf32>
    %246 = arith.maximumf %244, %245 : vector<32x128xf32>
    %247 = arith.truncf %246 : vector<32x128xf32> to vector<32x128xbf16>
    %cst_68 = arith.constant dense<0.000000e+00> : vector<32x128xf32>
    %248 = tpu.matmul %3, %247, %cst_68 {dimension_numbers = #tpu.dot_dimension_numbers<[1], [0], [0], [1], [0, 0, 1, 1], [], []>} : vector<32x32xbf16>, vector<32x128xbf16>, vector<32x128xf32> -> vector<32x128xf32>
    %249 = arith.addf %248, %10 : vector<32x128xf32>
    %cst_69 = arith.constant 0.000000e+00 : f32
    %250 = vector.broadcast %cst_69 : f32 to vector<32x128xf32>
    %251 = arith.maximumf %249, %250 : vector<32x128xf32>
    %252 = arith.truncf %251 : vector<32x128xf32> to vector<32x128xbf16>
    %cst_70 = arith.constant dense<0.000000e+00> : vector<2x128xf32>
    %253 = tpu.matmul %5, %252, %cst_70 {dimension_numbers = #tpu.dot_dimension_numbers<[1], [0], [0], [1], [0, 0, 1, 1], [], []>} : vector<2x32xbf16>, vector<32x128xbf16>, vector<2x128xf32> -> vector<2x128xf32>
    %254 = arith.addf %253, %13 : vector<2x128xf32>
    %255 = arith.index_cast %c4_i32 : i32 to index
    %c0_71 = arith.constant 0 : index
    %256 = vector.load %arg1[%255, %c0_71] : memref<8x128xf32, #tpu.memory_space<vmem>>, vector<1x128xf32>
    %257 = vector.shape_cast %256 : vector<1x128xf32> to vector<1x128xf32>
    %258 = vector.broadcast %257 : vector<1x128xf32> to vector<4x128xf32>
    %259 = vector.extract_strided_slice %258 {offsets = [0, 0], sizes = [2, 128], strides = [1, 1]} : vector<4x128xf32> to vector<2x128xf32>
    %cst_72 = arith.constant 2.000000e-01 : f32
    %260 = vector.broadcast %cst_72 : f32 to vector<4x128xf32>
    %261 = arith.mulf %260, %219 : vector<4x128xf32>
    %cst_73 = arith.constant 1.000000e-01 : f32
    %262 = vector.broadcast %cst_73 : f32 to vector<4x128xf32>
    %263 = arith.mulf %262, %261 : vector<4x128xf32>
    %264 = arith.mulf %258, %258 : vector<4x128xf32>
    %265 = vector.broadcast %cst : f32 to vector<4x128xf32>
    %266 = arith.subf %264, %265 : vector<4x128xf32>
    %267 = arith.mulf %263, %266 : vector<4x128xf32>
    %cst_74 = arith.constant 5.000000e-02 : f32
    %268 = arith.mulf %cst_74, %cst : f32
    %269 = vector.broadcast %268 : f32 to vector<4x128xf32>
    %270 = arith.mulf %269, %219 : vector<4x128xf32>
    %271 = arith.addf %219, %270 : vector<4x128xf32>
    %272 = arith.mulf %261, %258 : vector<4x128xf32>
    %273 = arith.addf %271, %272 : vector<4x128xf32>
    %274 = arith.addf %273, %267 : vector<4x128xf32>
    %cst_75 = arith.constant 3.000000e-02 : f32
    %275 = vector.broadcast %cst_75 : f32 to vector<2x128xf32>
    %276 = arith.mulf %275, %235 : vector<2x128xf32>
    %cst_76 = arith.constant 1.000000e-01 : f32
    %277 = vector.broadcast %cst_76 : f32 to vector<2x128xf32>
    %278 = arith.mulf %277, %254 : vector<2x128xf32>
    %279 = arith.addf %276, %278 : vector<2x128xf32>
    %cst_77 = arith.constant dense<0.000000e+00> : vector<128xf32>
    %280 = vector.multi_reduction <add>, %274, %cst_77 [0] : vector<4x128xf32> to vector<128xf32>
    %281 = vector.shape_cast %280 : vector<128xf32> to vector<1x128xf32>
    %282 = vector.broadcast %cst_17 : f32 to vector<1x128xf32>
    %283 = arith.mulf %282, %281 : vector<1x128xf32>
    %284 = vector.broadcast %283 : vector<1x128xf32> to vector<2x128xf32>
    %285 = arith.addf %279, %284 : vector<2x128xf32>
    %286 = vector.broadcast %cst : f32 to vector<2x128xf32>
    %287 = arith.mulf %285, %286 : vector<2x128xf32>
    %288 = arith.subf %235, %287 : vector<2x128xf32>
    %289 = arith.mulf %254, %259 : vector<2x128xf32>
    %290 = arith.addf %288, %289 : vector<2x128xf32>
    %c5_i32 = arith.constant 5 : i32
    %291 = arith.sitofp %c5_i32 : i32 to f32
    %292 = arith.mulf %291, %cst : f32
    %293 = vector.broadcast %292 : f32 to vector<32x1xf32>
    %294 = arith.mulf %293, %6 : vector<32x1xf32>
    %295 = arith.addf %7, %294 : vector<32x1xf32>
    %296 = arith.truncf %274 : vector<4x128xf32> to vector<4x128xbf16>
    %cst_78 = arith.constant dense<0.000000e+00> : vector<32x128xf32>
    %297 = tpu.matmul %1, %296, %cst_78 {dimension_numbers = #tpu.dot_dimension_numbers<[1], [0], [0], [1], [0, 0, 1, 1], [], []>} : vector<32x4xbf16>, vector<4x128xbf16>, vector<32x128xf32> -> vector<32x128xf32>
    %298 = vector.broadcast %295 : vector<32x1xf32> to vector<32x128xf32>
    %299 = arith.addf %297, %298 : vector<32x128xf32>
    %cst_79 = arith.constant 0.000000e+00 : f32
    %300 = vector.broadcast %cst_79 : f32 to vector<32x128xf32>
    %301 = arith.maximumf %299, %300 : vector<32x128xf32>
    %302 = arith.truncf %301 : vector<32x128xf32> to vector<32x128xbf16>
    %cst_80 = arith.constant dense<0.000000e+00> : vector<32x128xf32>
    %303 = tpu.matmul %3, %302, %cst_80 {dimension_numbers = #tpu.dot_dimension_numbers<[1], [0], [0], [1], [0, 0, 1, 1], [], []>} : vector<32x32xbf16>, vector<32x128xbf16>, vector<32x128xf32> -> vector<32x128xf32>
    %304 = arith.addf %303, %10 : vector<32x128xf32>
    %cst_81 = arith.constant 0.000000e+00 : f32
    %305 = vector.broadcast %cst_81 : f32 to vector<32x128xf32>
    %306 = arith.maximumf %304, %305 : vector<32x128xf32>
    %307 = arith.truncf %306 : vector<32x128xf32> to vector<32x128xbf16>
    %cst_82 = arith.constant dense<0.000000e+00> : vector<2x128xf32>
    %308 = tpu.matmul %5, %307, %cst_82 {dimension_numbers = #tpu.dot_dimension_numbers<[1], [0], [0], [1], [0, 0, 1, 1], [], []>} : vector<2x32xbf16>, vector<32x128xbf16>, vector<2x128xf32> -> vector<2x128xf32>
    %309 = arith.addf %308, %13 : vector<2x128xf32>
    %310 = arith.index_cast %c5_i32 : i32 to index
    %c0_83 = arith.constant 0 : index
    %311 = vector.load %arg1[%310, %c0_83] : memref<8x128xf32, #tpu.memory_space<vmem>>, vector<1x128xf32>
    %312 = vector.shape_cast %311 : vector<1x128xf32> to vector<1x128xf32>
    %313 = vector.broadcast %312 : vector<1x128xf32> to vector<4x128xf32>
    %314 = vector.extract_strided_slice %313 {offsets = [0, 0], sizes = [2, 128], strides = [1, 1]} : vector<4x128xf32> to vector<2x128xf32>
    %cst_84 = arith.constant 2.000000e-01 : f32
    %315 = vector.broadcast %cst_84 : f32 to vector<4x128xf32>
    %316 = arith.mulf %315, %274 : vector<4x128xf32>
    %cst_85 = arith.constant 1.000000e-01 : f32
    %317 = vector.broadcast %cst_85 : f32 to vector<4x128xf32>
    %318 = arith.mulf %317, %316 : vector<4x128xf32>
    %319 = arith.mulf %313, %313 : vector<4x128xf32>
    %320 = vector.broadcast %cst : f32 to vector<4x128xf32>
    %321 = arith.subf %319, %320 : vector<4x128xf32>
    %322 = arith.mulf %318, %321 : vector<4x128xf32>
    %cst_86 = arith.constant 5.000000e-02 : f32
    %323 = arith.mulf %cst_86, %cst : f32
    %324 = vector.broadcast %323 : f32 to vector<4x128xf32>
    %325 = arith.mulf %324, %274 : vector<4x128xf32>
    %326 = arith.addf %274, %325 : vector<4x128xf32>
    %327 = arith.mulf %316, %313 : vector<4x128xf32>
    %328 = arith.addf %326, %327 : vector<4x128xf32>
    %329 = arith.addf %328, %322 : vector<4x128xf32>
    %cst_87 = arith.constant 3.000000e-02 : f32
    %330 = vector.broadcast %cst_87 : f32 to vector<2x128xf32>
    %331 = arith.mulf %330, %290 : vector<2x128xf32>
    %cst_88 = arith.constant 1.000000e-01 : f32
    %332 = vector.broadcast %cst_88 : f32 to vector<2x128xf32>
    %333 = arith.mulf %332, %309 : vector<2x128xf32>
    %334 = arith.addf %331, %333 : vector<2x128xf32>
    %cst_89 = arith.constant dense<0.000000e+00> : vector<128xf32>
    %335 = vector.multi_reduction <add>, %329, %cst_89 [0] : vector<4x128xf32> to vector<128xf32>
    %336 = vector.shape_cast %335 : vector<128xf32> to vector<1x128xf32>
    %337 = vector.broadcast %cst_17 : f32 to vector<1x128xf32>
    %338 = arith.mulf %337, %336 : vector<1x128xf32>
    %339 = vector.broadcast %338 : vector<1x128xf32> to vector<2x128xf32>
    %340 = arith.addf %334, %339 : vector<2x128xf32>
    %341 = vector.broadcast %cst : f32 to vector<2x128xf32>
    %342 = arith.mulf %340, %341 : vector<2x128xf32>
    %343 = arith.subf %290, %342 : vector<2x128xf32>
    %344 = arith.mulf %309, %314 : vector<2x128xf32>
    %345 = arith.addf %343, %344 : vector<2x128xf32>
    %c6_i32 = arith.constant 6 : i32
    %346 = arith.sitofp %c6_i32 : i32 to f32
    %347 = arith.mulf %346, %cst : f32
    %348 = vector.broadcast %347 : f32 to vector<32x1xf32>
    %349 = arith.mulf %348, %6 : vector<32x1xf32>
    %350 = arith.addf %7, %349 : vector<32x1xf32>
    %351 = arith.truncf %329 : vector<4x128xf32> to vector<4x128xbf16>
    %cst_90 = arith.constant dense<0.000000e+00> : vector<32x128xf32>
    %352 = tpu.matmul %1, %351, %cst_90 {dimension_numbers = #tpu.dot_dimension_numbers<[1], [0], [0], [1], [0, 0, 1, 1], [], []>} : vector<32x4xbf16>, vector<4x128xbf16>, vector<32x128xf32> -> vector<32x128xf32>
    %353 = vector.broadcast %350 : vector<32x1xf32> to vector<32x128xf32>
    %354 = arith.addf %352, %353 : vector<32x128xf32>
    %cst_91 = arith.constant 0.000000e+00 : f32
    %355 = vector.broadcast %cst_91 : f32 to vector<32x128xf32>
    %356 = arith.maximumf %354, %355 : vector<32x128xf32>
    %357 = arith.truncf %356 : vector<32x128xf32> to vector<32x128xbf16>
    %cst_92 = arith.constant dense<0.000000e+00> : vector<32x128xf32>
    %358 = tpu.matmul %3, %357, %cst_92 {dimension_numbers = #tpu.dot_dimension_numbers<[1], [0], [0], [1], [0, 0, 1, 1], [], []>} : vector<32x32xbf16>, vector<32x128xbf16>, vector<32x128xf32> -> vector<32x128xf32>
    %359 = arith.addf %358, %10 : vector<32x128xf32>
    %cst_93 = arith.constant 0.000000e+00 : f32
    %360 = vector.broadcast %cst_93 : f32 to vector<32x128xf32>
    %361 = arith.maximumf %359, %360 : vector<32x128xf32>
    %362 = arith.truncf %361 : vector<32x128xf32> to vector<32x128xbf16>
    %cst_94 = arith.constant dense<0.000000e+00> : vector<2x128xf32>
    %363 = tpu.matmul %5, %362, %cst_94 {dimension_numbers = #tpu.dot_dimension_numbers<[1], [0], [0], [1], [0, 0, 1, 1], [], []>} : vector<2x32xbf16>, vector<32x128xbf16>, vector<2x128xf32> -> vector<2x128xf32>
    %364 = arith.addf %363, %13 : vector<2x128xf32>
    %365 = arith.index_cast %c6_i32 : i32 to index
    %c0_95 = arith.constant 0 : index
    %366 = vector.load %arg1[%365, %c0_95] : memref<8x128xf32, #tpu.memory_space<vmem>>, vector<1x128xf32>
    %367 = vector.shape_cast %366 : vector<1x128xf32> to vector<1x128xf32>
    %368 = vector.broadcast %367 : vector<1x128xf32> to vector<4x128xf32>
    %369 = vector.extract_strided_slice %368 {offsets = [0, 0], sizes = [2, 128], strides = [1, 1]} : vector<4x128xf32> to vector<2x128xf32>
    %cst_96 = arith.constant 2.000000e-01 : f32
    %370 = vector.broadcast %cst_96 : f32 to vector<4x128xf32>
    %371 = arith.mulf %370, %329 : vector<4x128xf32>
    %cst_97 = arith.constant 1.000000e-01 : f32
    %372 = vector.broadcast %cst_97 : f32 to vector<4x128xf32>
    %373 = arith.mulf %372, %371 : vector<4x128xf32>
    %374 = arith.mulf %368, %368 : vector<4x128xf32>
    %375 = vector.broadcast %cst : f32 to vector<4x128xf32>
    %376 = arith.subf %374, %375 : vector<4x128xf32>
    %377 = arith.mulf %373, %376 : vector<4x128xf32>
    %cst_98 = arith.constant 5.000000e-02 : f32
    %378 = arith.mulf %cst_98, %cst : f32
    %379 = vector.broadcast %378 : f32 to vector<4x128xf32>
    %380 = arith.mulf %379, %329 : vector<4x128xf32>
    %381 = arith.addf %329, %380 : vector<4x128xf32>
    %382 = arith.mulf %371, %368 : vector<4x128xf32>
    %383 = arith.addf %381, %382 : vector<4x128xf32>
    %384 = arith.addf %383, %377 : vector<4x128xf32>
    %cst_99 = arith.constant 3.000000e-02 : f32
    %385 = vector.broadcast %cst_99 : f32 to vector<2x128xf32>
    %386 = arith.mulf %385, %345 : vector<2x128xf32>
    %cst_100 = arith.constant 1.000000e-01 : f32
    %387 = vector.broadcast %cst_100 : f32 to vector<2x128xf32>
    %388 = arith.mulf %387, %364 : vector<2x128xf32>
    %389 = arith.addf %386, %388 : vector<2x128xf32>
    %cst_101 = arith.constant dense<0.000000e+00> : vector<128xf32>
    %390 = vector.multi_reduction <add>, %384, %cst_101 [0] : vector<4x128xf32> to vector<128xf32>
    %391 = vector.shape_cast %390 : vector<128xf32> to vector<1x128xf32>
    %392 = vector.broadcast %cst_17 : f32 to vector<1x128xf32>
    %393 = arith.mulf %392, %391 : vector<1x128xf32>
    %394 = vector.broadcast %393 : vector<1x128xf32> to vector<2x128xf32>
    %395 = arith.addf %389, %394 : vector<2x128xf32>
    %396 = vector.broadcast %cst : f32 to vector<2x128xf32>
    %397 = arith.mulf %395, %396 : vector<2x128xf32>
    %398 = arith.subf %345, %397 : vector<2x128xf32>
    %399 = arith.mulf %364, %369 : vector<2x128xf32>
    %400 = arith.addf %398, %399 : vector<2x128xf32>
    %c7_i32 = arith.constant 7 : i32
    %401 = arith.sitofp %c7_i32 : i32 to f32
    %402 = arith.mulf %401, %cst : f32
    %403 = vector.broadcast %402 : f32 to vector<32x1xf32>
    %404 = arith.mulf %403, %6 : vector<32x1xf32>
    %405 = arith.addf %7, %404 : vector<32x1xf32>
    %406 = arith.truncf %384 : vector<4x128xf32> to vector<4x128xbf16>
    %cst_102 = arith.constant dense<0.000000e+00> : vector<32x128xf32>
    %407 = tpu.matmul %1, %406, %cst_102 {dimension_numbers = #tpu.dot_dimension_numbers<[1], [0], [0], [1], [0, 0, 1, 1], [], []>} : vector<32x4xbf16>, vector<4x128xbf16>, vector<32x128xf32> -> vector<32x128xf32>
    %408 = vector.broadcast %405 : vector<32x1xf32> to vector<32x128xf32>
    %409 = arith.addf %407, %408 : vector<32x128xf32>
    %cst_103 = arith.constant 0.000000e+00 : f32
    %410 = vector.broadcast %cst_103 : f32 to vector<32x128xf32>
    %411 = arith.maximumf %409, %410 : vector<32x128xf32>
    %412 = arith.truncf %411 : vector<32x128xf32> to vector<32x128xbf16>
    %cst_104 = arith.constant dense<0.000000e+00> : vector<32x128xf32>
    %413 = tpu.matmul %3, %412, %cst_104 {dimension_numbers = #tpu.dot_dimension_numbers<[1], [0], [0], [1], [0, 0, 1, 1], [], []>} : vector<32x32xbf16>, vector<32x128xbf16>, vector<32x128xf32> -> vector<32x128xf32>
    %414 = arith.addf %413, %10 : vector<32x128xf32>
    %cst_105 = arith.constant 0.000000e+00 : f32
    %415 = vector.broadcast %cst_105 : f32 to vector<32x128xf32>
    %416 = arith.maximumf %414, %415 : vector<32x128xf32>
    %417 = arith.truncf %416 : vector<32x128xf32> to vector<32x128xbf16>
    %cst_106 = arith.constant dense<0.000000e+00> : vector<2x128xf32>
    %418 = tpu.matmul %5, %417, %cst_106 {dimension_numbers = #tpu.dot_dimension_numbers<[1], [0], [0], [1], [0, 0, 1, 1], [], []>} : vector<2x32xbf16>, vector<32x128xbf16>, vector<2x128xf32> -> vector<2x128xf32>
    %419 = arith.addf %418, %13 : vector<2x128xf32>
    %420 = arith.index_cast %c7_i32 : i32 to index
    %c0_107 = arith.constant 0 : index
    %421 = vector.load %arg1[%420, %c0_107] : memref<8x128xf32, #tpu.memory_space<vmem>>, vector<1x128xf32>
    %422 = vector.shape_cast %421 : vector<1x128xf32> to vector<1x128xf32>
    %423 = vector.broadcast %422 : vector<1x128xf32> to vector<4x128xf32>
    %424 = vector.extract_strided_slice %423 {offsets = [0, 0], sizes = [2, 128], strides = [1, 1]} : vector<4x128xf32> to vector<2x128xf32>
    %cst_108 = arith.constant 2.000000e-01 : f32
    %425 = vector.broadcast %cst_108 : f32 to vector<4x128xf32>
    %426 = arith.mulf %425, %384 : vector<4x128xf32>
    %cst_109 = arith.constant 1.000000e-01 : f32
    %427 = vector.broadcast %cst_109 : f32 to vector<4x128xf32>
    %428 = arith.mulf %427, %426 : vector<4x128xf32>
    %429 = arith.mulf %423, %423 : vector<4x128xf32>
    %430 = vector.broadcast %cst : f32 to vector<4x128xf32>
    %431 = arith.subf %429, %430 : vector<4x128xf32>
    %432 = arith.mulf %428, %431 : vector<4x128xf32>
    %cst_110 = arith.constant 5.000000e-02 : f32
    %433 = arith.mulf %cst_110, %cst : f32
    %434 = vector.broadcast %433 : f32 to vector<4x128xf32>
    %435 = arith.mulf %434, %384 : vector<4x128xf32>
    %436 = arith.addf %384, %435 : vector<4x128xf32>
    %437 = arith.mulf %426, %423 : vector<4x128xf32>
    %438 = arith.addf %436, %437 : vector<4x128xf32>
    %439 = arith.addf %438, %432 : vector<4x128xf32>
    %cst_111 = arith.constant 3.000000e-02 : f32
    %440 = vector.broadcast %cst_111 : f32 to vector<2x128xf32>
    %441 = arith.mulf %440, %400 : vector<2x128xf32>
    %cst_112 = arith.constant 1.000000e-01 : f32
    %442 = vector.broadcast %cst_112 : f32 to vector<2x128xf32>
    %443 = arith.mulf %442, %419 : vector<2x128xf32>
    %444 = arith.addf %441, %443 : vector<2x128xf32>
    %cst_113 = arith.constant dense<0.000000e+00> : vector<128xf32>
    %445 = vector.multi_reduction <add>, %439, %cst_113 [0] : vector<4x128xf32> to vector<128xf32>
    %446 = vector.shape_cast %445 : vector<128xf32> to vector<1x128xf32>
    %447 = vector.broadcast %cst_17 : f32 to vector<1x128xf32>
    %448 = arith.mulf %447, %446 : vector<1x128xf32>
    %449 = vector.broadcast %448 : vector<1x128xf32> to vector<2x128xf32>
    %450 = arith.addf %444, %449 : vector<2x128xf32>
    %451 = vector.broadcast %cst : f32 to vector<2x128xf32>
    %452 = arith.mulf %450, %451 : vector<2x128xf32>
    %453 = arith.subf %400, %452 : vector<2x128xf32>
    %454 = arith.mulf %419, %424 : vector<2x128xf32>
    %455 = arith.addf %453, %454 : vector<2x128xf32>
    %c8_i32 = arith.constant 8 : i32
    %c0_114 = arith.constant 0 : index
    %c0_115 = arith.constant 0 : index
    %456 = vector.load %arg11[%c0_114, %c0_115] : memref<4x128xf32, #tpu.memory_space<vmem>>, vector<4x128xf32>
    tpu.vector_store %arg11[%c0_114, %c0_115], %439 {strides = array<i32>} : memref<4x128xf32, #tpu.memory_space<vmem>>, vector<4x128xf32>,
    %c0_116 = arith.constant 0 : index
    %c0_117 = arith.constant 0 : index
    %457 = vector.load %arg12[%c0_116, %c0_117] : memref<2x128xf32, #tpu.memory_space<vmem>>, vector<2x128xf32>
    tpu.vector_store %arg12[%c0_116, %c0_117], %455 {strides = array<i32>} : memref<2x128xf32, #tpu.memory_space<vmem>>, vector<2x128xf32>,
    return
  }
  func.func @transform_0(%arg0: i32) -> (i32, i32) {
    %c0_i32 = arith.constant 0 : i32
    %c0_i32_0 = arith.constant 0 : i32
    return %arg0, %c0_i32 : i32, i32
  }
  func.func @transform_1(%arg0: i32) -> (i32, i32) {
    %c0_i32 = arith.constant 0 : i32
    %c0_i32_0 = arith.constant 0 : i32
    return %c0_i32, %arg0 : i32, i32
  }
  func.func @transform_2(%arg0: i32) -> (i32, i32) {
    %c0_i32 = arith.constant 0 : i32
    %c0_i32_0 = arith.constant 0 : i32
    return %c0_i32, %arg0 : i32, i32
  }
  func.func @transform_3(%arg0: i32) -> (i32, i32) {
    %c0_i32 = arith.constant 0 : i32
    %c0_i32_0 = arith.constant 0 : i32
    %c0_i32_1 = arith.constant 0 : i32
    return %c0_i32, %c0_i32_0 : i32, i32
  }
  func.func @transform_4(%arg0: i32) -> (i32, i32) {
    %c0_i32 = arith.constant 0 : i32
    %c0_i32_0 = arith.constant 0 : i32
    %c0_i32_1 = arith.constant 0 : i32
    return %c0_i32, %c0_i32_0 : i32, i32
  }
  func.func @transform_5(%arg0: i32) -> (i32, i32) {
    %c0_i32 = arith.constant 0 : i32
    %c0_i32_0 = arith.constant 0 : i32
    %c0_i32_1 = arith.constant 0 : i32
    return %c0_i32, %c0_i32_0 : i32, i32
  }
  func.func @transform_6(%arg0: i32) -> (i32, i32) {
    %c0_i32 = arith.constant 0 : i32
    %c0_i32_0 = arith.constant 0 : i32
    %c0_i32_1 = arith.constant 0 : i32
    return %c0_i32, %c0_i32_0 : i32, i32
  }
  func.func @transform_7(%arg0: i32) -> (i32, i32) {
    %c0_i32 = arith.constant 0 : i32
    %c0_i32_0 = arith.constant 0 : i32
    %c0_i32_1 = arith.constant 0 : i32
    return %c0_i32, %c0_i32_0 : i32, i32
  }
  func.func @transform_8(%arg0: i32) -> (i32, i32) {
    %c0_i32 = arith.constant 0 : i32
    %c0_i32_0 = arith.constant 0 : i32
    %c0_i32_1 = arith.constant 0 : i32
    return %c0_i32, %c0_i32_0 : i32, i32
  }
  func.func @transform_9(%arg0: i32) -> (i32, i32) {
    %c0_i32 = arith.constant 0 : i32
    %c0_i32_0 = arith.constant 0 : i32
    %c0_i32_1 = arith.constant 0 : i32
    return %c0_i32, %c0_i32_0 : i32, i32
  }
  func.func @transform_10(%arg0: i32) -> (i32, i32) {
    %c0_i32 = arith.constant 0 : i32
    %c0_i32_0 = arith.constant 0 : i32
    return %c0_i32, %arg0 : i32, i32
  }
  func.func @transform_11(%arg0: i32) -> (i32, i32) {
    %c0_i32 = arith.constant 0 : i32
    %c0_i32_0 = arith.constant 0 : i32
    return %c0_i32, %arg0 : i32, i32
  }
}

</mosaic_0001>

<bundles_post_ra>
// kernel: tpu_custom_call.1
= control target key start
LH: loop header
LB: loop body
LE: loop exit
PB: predicated region body
PF: predicated region fallthrough
CT: control target
= control target key end

     0   :  { %17 = vsyncpa [#allocation3], 0  ;;  %vm130_vm0 = vcmask 1041408   ;;  %vm123_vm1 = vcmask 31744   ;;  %v2222_v8 = vmov 0   ;;  %s2850_s0 = inlined_call_operand.vmem [shape: f32[8,128], index: 0, kind: input, shape index: {}]   ;;  %s2851_s1 = inlined_call_operand.vmem [shape: f32[4,128], index: 1, kind: input, shape index: {}]   ;;  %s2852_s2 = inlined_call_operand.vmem [shape: f32[2,128], index: 2, kind: input, shape index: {}]   ;;  %s2853_s3 = inlined_call_operand.vmem [shape: f32[32,4], index: 3, kind: input, shape index: {}]   ;;  %s2854_s4 = inlined_call_operand.vmem [shape: f32[32,1], index: 4, kind: input, shape index: {}]   ;;  %s2855_s5 = inlined_call_operand.vmem [shape: f32[32,1], index: 5, kind: input, shape index: {}]   ;;  %s2856_s6 = inlined_call_operand.vmem [shape: f32[32,32], index: 6, kind: input, shape index: {}]   ;;  %s2857_s7 = inlined_call_operand.vmem [shape: f32[32,1], index: 7, kind: input, shape index: {}]   ;;  %s2858_s8 = inlined_call_operand.vmem [shape: f32[2,32], index: 8, kind: input, shape index: {}]   ;;  %s2859_s9 = inlined_call_operand.vmem [shape: f32[2,1], index: 9, kind: input, shape index: {}]   ;;  %s2860_s10 = inlined_call_operand.hbm [shape: f32[4,128], index: 10, kind: output, shape index: {0}]   ;;  %s2861_s11 = inlined_call_operand.hbm [shape: f32[2,128], index: 11, kind: output, shape index: {1}]  }
   0x1   :  { %v2290_v0 = vld [vmem:[%s2851_s1] sm:$0xf]  ;;  %v41_v3 = vld [vmem:[%s2853_s3 + $0x8] sm:$0xff]  ;;  %v42_v4 = vld [vmem:[%s2853_s3 + $0x10] sm:$0xff]  ;;  %2172 = vset.pattern.permute.xlu0 %v2222_v8  ;;  %2173 = vset.pattern.permute.xlu1 %v2222_v8 }
   0x2   :  { %v40_v1 = vld [vmem:[%s2853_s3] sm:$0xff]  ;;  %v102_v2 = vpack.c.bf16 %v2290_v0, %v2290_v0  ;;  %v43_v6 = vld [vmem:[%s2853_s3 + $0x18] sm:$0xff]  ;;  %v2322_v10 = vld [vmem:[%s2854_s4 + $0x8] sm:$0xff] }
   0x3   :  { %v2303_v5 = vpack.c.bf16 %v41_v3, %v40_v1  ;;  %v2311_v7 = vld [vmem:[%s2854_s4] sm:$0xff]  ;;  %v2327_v11 = vld [vmem:[%s2854_s4 + $0x10] sm:$0xff]  ;;  %v2332_v13 = vpack.c.bf16 %v43_v6, %v42_v4  ;;  %v95_v15 = vmul.f32 0.0, %v2322_v10  ;;  %v2344_v17 = vld [vmem:[%s2854_s4 + $0x18] sm:$0xff] }
   0x4   :  { %2159 = vmatprep.subr.msk.bf16.mxu0 %vm130_vm0, %v102_v2  ;;  %v2317_v9 = vld [vmem:[%s2855_s5] sm:$0xff]  ;;  %v132_v12 = vsel %vm130_vm0, %v102_v2, 0  ;;  %v94_v14 = vmul.f32 0.0, %v2311_v7  ;;  %v2339_v16 = vld [vmem:[%s2855_s5 + $0x10] sm:$0xff]  ;;  %v2349_v18 = vld [vmem:[%s2855_s5 + $0x8] sm:$0xff]  ;;  %v96_v19 = vmul.f32 0.0, %v2327_v11 }
   0x5   :  { %1985 = vmatprep.mubr.msk.bf16.mxu0 %vm123_vm1, %v2303_v5  ;;  %1984 = vmatpush3.bf16.msra.mxu0 %v132_v12  ;;  %v97_v20 = vmul.f32 0.0, %v2344_v17  ;;  %v2357_v22 = vld [vmem:[%s2855_s5 + $0x18] sm:$0xff] }
   0x6   :  { %v98_v21 = vadd.f32 %v94_v14, %v2317_v9  ;;  %v100_v23 = vadd.f32 %v96_v19, %v2339_v16 }
   0x7   :  { %18 = vsyncpa [#allocation5], 0  ;;  %v99_v24 = vadd.f32 %v95_v15, %v2349_v18  ;;  %v101_v25 = vadd.f32 %v97_v20, %v2357_v22  ;;  %v62_v26 = vld [vmem:[%s2857_s7] sm:$0xff]  ;;  %v63_v27 = vld [vmem:[%s2857_s7 + $0x8] sm:$0xff]  ;;  %v326_v28 = vmul.f32 0.125, %v2311_v7  ;;  %v327_v30 = vmul.f32 0.125, %v2322_v10 }
   0x8   :  { %1986 = vmatmul.mubr.msk.bf16.vlgmr.msra.gmra.mrb[0].mxu0 %vm123_vm1, %v2332_v13  ;;  %105 = vperm.xlu0 %2172, %v98_v21   ;;  %v64_v29 = vld [vmem:[%s2857_s7 + $0x10] sm:$0xff]  ;;  %v1604_v31 = vmul.f32 0.875, %v2311_v7  ;;  %v65_v32 = vld [vmem:[%s2857_s7 + $0x18] sm:$0xff]  ;;  %v1606_v33 = vmul.f32 0.875, %v2327_v11  ;;  %v328_v36 = vmul.f32 0.125, %v2327_v11  ;;  %v1607_v38 = vmul.f32 0.875, %v2344_v17 }
   0x9   :  { %115 = vperm.xlu1 %2173, %v100_v23   ;;  %v330_v35 = vadd.f32 %v326_v28, %v2317_v9  ;;  %v331_v39 = vadd.f32 %v327_v30, %v2349_v18  ;;  %v329_v40 = vmul.f32 0.125, %v2344_v17  ;;  %v539_v43 = vmul.f32 0.25, %v2311_v7  ;;  %s2225_s28 = smov [#allocation2]  }
   0xa   :  { %v2381_v34 = vadd.f32 %v1604_v31, %v2317_v9  ;;  %v2386_v37 = vadd.f32 %v1606_v33, %v2339_v16  ;;  %v2392_v41 = vadd.f32 %v1607_v38, %v2357_v22  ;;  %v332_v42 = vadd.f32 %v328_v36, %v2339_v16  ;;  %s1825_s29 = sshll.u32 %s2225_s28, 4  ;;  %s1826_s29 = int_to_ptr.vmem [resolvable:$true] %s1825_s29 }
   0xb   :  { %v333_v44 = vadd.f32 %v329_v40, %v2357_v22  ;;  %v540_v45 = vmul.f32 0.25, %v2322_v10  ;;  %v543_v46 = vadd.f32 %v539_v43, %v2317_v9  ;;  %v541_v47 = vmul.f32 0.25, %v2327_v11  ;;  %s2174_s30 = scalar_lea.vmem %s1826_s29, 64  ;;  %p2179_p1 = scmp.lt.s32.totalorder %s1826_s29, %s1826_s29 }
   0xc   :  { %110 = vperm.xlu0 %2172, %v99_v24   ;;  %v542_v49 = vmul.f32 0.25, %v2344_v17  ;;  %v752_v51 = vmul.f32 0.375, %v2311_v7  ;;  %v753_v53 = vmul.f32 0.375, %v2322_v10  ;;  %v754_v55 = vmul.f32 0.375, %v2327_v11  ;;  %p2175_p0 = scmp.ne.s32.totalorder %s1826_s29, %s2174_s30  ;;  %p2180_p2 = scmp.lt.s32.totalorder %s2174_s30, %s2174_s30 }
   0xd   :  { %120 = vperm.xlu1 %2173, %v101_v25   ;;  %v544_v48 = vadd.f32 %v540_v45, %v2349_v18  ;;  %v545_v50 = vadd.f32 %v541_v47, %v2339_v16  ;;  %v755_v57 = vmul.f32 0.375, %v2344_v17  ;;  %v965_v59 = vmul.f32 0.5, %v2311_v7 }
   0xe   :  { %v546_v52 = vadd.f32 %v542_v49, %v2357_v22  ;;  %v756_v54 = vadd.f32 %v752_v51, %v2317_v9  ;;  %v757_v56 = vadd.f32 %v753_v53, %v2349_v18  ;;  %v758_v58 = vadd.f32 %v754_v55, %v2339_v16  ;;  %p2181_p3 = por %p2180_p2, %p2179_p1 }
   0xf   :  { %v759_v60 = vadd.f32 %v755_v57, %v2357_v22  ;;  %v966_v61 = vmul.f32 0.5, %v2322_v10  ;;  %v969_v62 = vadd.f32 %v965_v59, %v2317_v9  ;;  %v967_v63 = vmul.f32 0.5, %v2327_v11  ;;  %v48_v57 = vld [vmem:[%s2856_s6 + $0x10] sm:$0xff] }
  0x10   :  { %68 = vperm.xlu0 %2172, %v62_v26   ;;  %v968_v2 = vmul.f32 0.5, %v2344_v17  ;;  %v1178_v4 = vmul.f32 0.625, %v2311_v7  ;;  %v1179_v8 = vmul.f32 0.625, %v2322_v10  ;;  %v1180_v14 = vmul.f32 0.625, %v2327_v11  ;;  %p2182_p4 = pnand %p2181_p3, %p2175_p0 }
  0x11   :  { %73 = vperm.xlu1 %2173, %v63_v27   ;;  %v970_v1 = vadd.f32 %v966_v61, %v2349_v18  ;;  %v971_v3 = vadd.f32 %v967_v63, %v2339_v16  ;;  %v1181_v19 = vmul.f32 0.625, %v2344_v17  ;;  %v1391_v21 = vmul.f32 0.75, %v2311_v7 }
  0x12   :  { %v972_v6 = vadd.f32 %v968_v2, %v2357_v22  ;;  %v1182_v12 = vadd.f32 %v1178_v4, %v2317_v9  ;;  %v1183_v15 = vadd.f32 %v1179_v8, %v2349_v18  ;;  %v1184_v20 = vadd.f32 %v1180_v14, %v2339_v16 }
  0x13   :  { %v1185_v23 = vadd.f32 %v1181_v19, %v2357_v22  ;;  %v1392_v24 = vmul.f32 0.75, %v2322_v10  ;;  %v1395_v25 = vadd.f32 %v1391_v21, %v2317_v9  ;;  %v1393_v26 = vmul.f32 0.75, %v2327_v11  ;;  %v86_v9 = vld [vmem:[%s2859_s9] sm:$0x3]  ;;  %v47_v11 = vld [vmem:[%s2856_s6 + $0x8] sm:$0xff] }
  0x14   :  { %78 = vperm.xlu0 %2172, %v64_v29   ;;  %v1394_v28 = vmul.f32 0.75, %v2344_v17  ;;  %v1605_v30 = vmul.f32 0.875, %v2322_v10  ;;  %v46_v10 = vld [vmem:[%s2856_s6] sm:$0xff]  ;;  %vm189_vm2 = vcmask 261120   ;;  %vm2224_vm3 = vmmov 0  }
  0x15   :  { %83 = vperm.xlu1 %2173, %v65_v32   ;;  %v1396_v27 = vadd.f32 %v1392_v24, %v2349_v18  ;;  %v1397_v29 = vadd.f32 %v1393_v26, %v2339_v16  ;;  %v2450_v16 = vpack.c.bf16 %v47_v11, %v46_v10  ;;  %v2457_v17 = vld [vmem:[%s2850_s0] ss:$0 sm:$0xff]  ;;  %v304_v32 = vmul.f32 0.00625, %v2290_v0 }
  0x16   :  { %v1398_v7 = vadd.f32 %v1394_v28, %v2357_v22  ;;  %v1609_v31 = vadd.f32 %v1605_v30, %v2349_v18  ;;  %v299_v18 = vmul.f32 0.2, %v2290_v0  ;;  %v301_v22 = vmul.f32 %v2457_v17, %v2457_v17 }
  0x17   :  { %1993 = vmatprep.mubr.msk.bf16.mxu1 %vm189_vm2, %v2450_v16  ;;  %vm312_vm4 = vcmask 1043456  }
  0x18   :  { %337 = vperm.xlu0 %2172, %v330_v35   ;;  %v300_v35 = vmul.f32 0.1, %v299_v18  ;;  %v1853_v36 = vadd.f32 -0.125, %v301_v22  ;;  %v306_v38 = vmul.f32 %v2457_v17, %v299_v18 }
  0x19   :  { %342 = vperm.xlu1 %2173, %v331_v39  }
  0x1c   :  { %347 = vperm.xlu0 %2172, %v332_v42  }
  0x1d   :  { %352 = vperm.xlu1 %2173, %v333_v44  }
  0x20   :  { %550 = vperm.xlu0 %2172, %v543_v46  }
  0x21   :  { %555 = vperm.xlu1 %2173, %v544_v48   ;;  %v303_v48 = vmul.f32 %v1853_v36, %v300_v35 }
  0x24   :  { %560 = vperm.xlu0 %2172, %v545_v50  }
  0x25   :  { %565 = vperm.xlu1 %2173, %v546_v52  }
  0x28   :  { %763 = vperm.xlu0 %2172, %v756_v54  }
  0x29   :  { %768 = vperm.xlu1 %2173, %v757_v56  }
  0x2c   :  { %773 = vperm.xlu0 %2172, %v758_v58   ;;  %v49_v58 = vld [vmem:[%s2856_s6 + $0x18] sm:$0xff] }
  0x2d   :  { %778 = vperm.xlu1 %2173, %v759_v60   ;;  %v2475_v60 = vpack.c.bf16 %v49_v58, %v48_v57 }
  0x30   :  { %976 = vperm.xlu0 %2172, %v969_v62   ;;  %v2223_v62 = vmov 0.0  }
  0x31   :  { %981 = vperm.xlu1 %2173, %v970_v1   ;;  %1997 = vmatprep.subr.bf16.mxu0 %v2223_v62 }
  0x32   :  { %2001 = vmatprep.mubr.msk.bf16.mxu0 %vm2224_vm3, %v2223_v62 }
  0x34   :  { %986 = vperm.xlu0 %2172, %v971_v3  }
  0x35   :  { %991 = vperm.xlu1 %2173, %v972_v6  }
  0x38   :  { %1189 = vperm.xlu0 %2172, %v1182_v12   ;;  %v2503_v12 = vld [vmem:[%s2850_s0 + $0x1] ss:$0 sm:$0xff] }
  0x39   :  { %1194 = vperm.xlu1 %2173, %v1183_v15   ;;  %v515_v26 = vmul.f32 %v2503_v12, %v2503_v12 }
  0x3b   :  { %v1860_v22 = vadd.f32 -0.125, %v515_v26 }
  0x3c   :  { %1199 = vperm.xlu0 %2172, %v1184_v20  }
  0x3d   :  { %1204 = vperm.xlu1 %2173, %v1185_v23  }
  0x40   :  { %1402 = vperm.xlu0 %2172, %v1395_v25  }
  0x41   :  { %1407 = vperm.xlu1 %2173, %v1396_v27  }
  0x44   :  { %1412 = vperm.xlu0 %2172, %v1397_v29  }
  0x45   :  { %1417 = vperm.xlu1 %2173, %v1398_v7  }
  0x48   :  { %1615 = vperm.xlu0 %2172, %v2381_v34  }
  0x49   :  { %1620 = vperm.xlu1 %2173, %v1609_v31  }
  0x4c   :  { %1625 = vperm.xlu0 %2172, %v2386_v37   ;;  %v305_v37 = vadd.f32 %v304_v32, %v2290_v0 }
  0x4d   :  { %1630 = vperm.xlu1 %2173, %v2392_v41  }
  0x4e   :  { %v307_v49 = vadd.f32 %v306_v38, %v305_v37 }
  0x50   :  { %89 = vperm.xlu0 %2172, %v86_v9   ;;  %v2465_v0 = vadd.f32 %v307_v49, %v303_v48 }
  0x52   :  { %v334_v59 = vpack.c.bf16 %v2465_v0, %v2465_v0  ;;  %v513_v23 = vmul.f32 0.2, %v2465_v0  ;;  %v518_v27 = vmul.f32 0.00625, %v2465_v0 }
  0x54   :  { %v356_v61 = vsel %vm130_vm0, %v334_v59, 0  ;;  %v514_v9 = vmul.f32 0.1, %v513_v23  ;;  %v519_v32 = vadd.f32 %v518_v27, %v2465_v0 }
  0x87   :  { %v106_v34 = vpop.permute.xlu0 %105 }
  0x88   :  { %v116_v33 = vpop.permute.xlu1 %115 }
  0x8b   :  { %v111_v45 = vpop.permute.xlu0 %110 }
  0x8c   :  { %v121_v42 = vpop.permute.xlu1 %120 }
  0x8f   :  { %v2491_v63 = vpop.permute.xlu0 %68 }
  0x90   :  { %v2493_v1 = vpop.permute.xlu1 %73 }
  0x93   :  { %v2495_v2 = vpop.permute.xlu0 %78 }
  0x94   :  { %v2497_v3 = vpop.permute.xlu1 %83 }
  0x97   :  { %v338_v14 = vpop.permute.xlu0 %337 }
  0x98   :  { %v343_v24 = vpop.permute.xlu1 %342 }
  0x9b   :  { %v348_v10 = vpop.permute.xlu0 %347 }
  0x9c   :  { %v353_v36 = vpop.permute.xlu1 %352 }
  0xdb   :  { %v1987_v39 = vpop.f32.mrb[0].mxu0 }
  0xdc   :  { %v177_v40 = vadd.f32 %v1987_v39, %v116_v33  ;;  %v168_v41 = vpop.f32.mrb[1].mxu0  ;;  %v520_v33 = vmul.f32 %v2503_v12, %v513_v23  ;;  %v52_v39 = vld [vmem:[%s2858_s8] sm:$0x3]  ;;  %v556_v23 = vpop.permute.xlu1 %555 }
  0xdd   :  { %v169_v43 = vadd.f32 %v168_v41, %v106_v34  ;;  %v1988_v44 = vpop.f32.mrb[2].mxu0 }
  0xde   :  { %v180_v46 = vadd.f32 %v1988_v44, %v121_v42  ;;  %v171_v47 = vpop.f32.mrb[3].mxu0  ;;  %v185_v51 = vmax.f32 %v177_v40, 0.0  ;;  %v521_v44 = vadd.f32 %v520_v33, %v519_v32 }
  0xdf   :  { %v172_v50 = vadd.f32 %v171_v47, %v111_v45  ;;  %v183_v53 = vmax.f32 %v169_v43, 0.0  ;;  %v517_v43 = vmul.f32 %v1860_v22, %v514_v9  ;;  %v2518_v47 = vpack.c.bf16 %v52_v39, %v52_v39 }
  0xe0   :  { %v186_v52 = vmax.f32 %v180_v46, 0.0 }
  0xe1   :  { %v184_v54 = vmax.f32 %v172_v50, 0.0 }
  0xe2   :  { %v188_v55 = vpack.c.bf16 %v186_v52, %v185_v51  ;;  %v2520_v52 = vadd.f32 %v521_v44, %v517_v43 }
  0xe3   :  { %v187_v56 = vpack.c.bf16 %v184_v54, %v183_v53 }
  0xe4   :  { %v547_v53 = vpack.c.bf16 %v2520_v52, %v2520_v52  ;;  %v731_v26 = vmul.f32 0.00625, %v2520_v52 }
  0xe5   :  { %1989 = vmatprep.subr.bf16.mxu1 %v187_v56 }
  0xe6   :  { %1990 = vmatpush3.bf16.msra.mxu1 %v187_v56  ;;  %v569_v54 = vsel %vm130_vm0, %v547_v53, 0  ;;  %v732_v22 = vadd.f32 %v731_v26, %v2520_v52 }
  0xe7   :  { %1991 = vmatprep.subr.bf16.mxu1 %v188_v55 }
  0xea   :  { %1992 = vmatpush3.bf16.msra.mxu1 %v188_v55 }
  0xeb   :  { %2160 = vmatprep.subr.msk.bf16.mxu1 %vm130_vm0, %v334_v59 }
  0xed   :  { %1994 = vmatmul.mubr.msk.bf16.vlgmr.msra.gmra.mrb[0].mxu1 %vm189_vm2, %v2475_v60 }
  0xee   :  { %2006 = vmatpush3.bf16.msra.mxu1 %v356_v61  ;;  %2007 = vmatprep.mubr.msk.bf16.mxu1 %vm123_vm1, %v2303_v5 }
  0xef   :  { %2019 = vmatprep.subr.bf16.mxu1 %v2223_v62 }
  0xf5   :  { %2008 = vmatmul.mubr.msk.bf16.vlgmr.msra.gmra.mrb[4].mxu1 %vm123_vm1, %v2332_v13 }
  0xf6   :  { %2023 = vmatprep.mubr.msk.bf16.mxu1 %vm2224_vm3, %v2223_v62 }
 0x1c0   :  { %v1995_v4 = vpop.f32.mrb[0].mxu1 }
 0x1c1   :  { %v239_v6 = vadd.f32 %v1995_v4, %v2495_v2  ;;  %v230_v8 = vpop.f32.mrb[1].mxu1 }
 0x1c2   :  { %v231_v15 = vadd.f32 %v230_v8, %v2491_v63  ;;  %v1996_v19 = vpop.f32.mrb[2].mxu1  ;;  %v551_v8 = vpop.permute.xlu0 %550 }
 0x1c3   :  { %v242_v20 = vadd.f32 %v1996_v19, %v2497_v3  ;;  %v233_v21 = vpop.f32.mrb[3].mxu1  ;;  %v247_v28 = vmax.f32 %v239_v6, 0.0  ;;  %v2545_v6 = vld [vmem:[%s2850_s0 + $0x2] ss:$0 sm:$0xff] }
 0x1c4   :  { %v234_v25 = vadd.f32 %v233_v21, %v2493_v1  ;;  %v245_v7 = vmax.f32 %v231_v15, 0.0  ;;  %v726_v21 = vmul.f32 0.2, %v2520_v52 }
 0x1c5   :  { %v248_v29 = vmax.f32 %v242_v20, 0.0 }
 0x1c6   :  { %v246_v30 = vmax.f32 %v234_v25, 0.0  ;;  %v728_v25 = vmul.f32 %v2545_v6, %v2545_v6  ;;  %v561_v9 = vpop.permute.xlu0 %560  ;;  %v733_v32 = vmul.f32 %v2545_v6, %v726_v21 }
 0x1c7   :  { %v250_v31 = vpack.c.bf16 %v248_v29, %v247_v28 }
 0x1c8   :  { %v249_v11 = vpack.c.bf16 %v246_v30, %v245_v7  ;;  %v2009_v18 = vpop.f32.mrb[4].mxu1 }
 0x1c9   :  { %v401_v34 = vadd.f32 %v2009_v18, %v348_v10  ;;  %v392_v35 = vpop.f32.mrb[5].mxu1  ;;  %v1867_v18 = vadd.f32 -0.125, %v728_v25 }
 0x1ca   :  { %v393_v37 = vadd.f32 %v392_v35, %v338_v14  ;;  %1998 = vmatpush3.bf16.msra.mxu0 %v249_v11  ;;  %v2010_v38 = vpop.f32.mrb[6].mxu1  ;;  %v566_v35 = vpop.permute.xlu1 %565 }
 0x1cb   :  { %v404_v40 = vadd.f32 %v2010_v38, %v353_v36  ;;  %v395_v41 = vpop.f32.mrb[7].mxu1  ;;  %1999 = vmatprep.subr.bf16.mxu0 %v2223_v62  ;;  %v409_v45 = vmax.f32 %v401_v34, 0.0 }
 0x1cc   :  { %v396_v42 = vadd.f32 %v395_v41, %v343_v24  ;;  %v407_v48 = vmax.f32 %v393_v37, 0.0 }
 0x1cd   :  { %v410_v46 = vmax.f32 %v404_v40, 0.0 }
 0x1ce   :  { %v408_v49 = vmax.f32 %v396_v42, 0.0  ;;  %2000 = vmatpush3.bf16.msra.mxu0 %v250_v31  ;;  %v727_v31 = vmul.f32 0.1, %v726_v21  ;;  %v734_v42 = vadd.f32 %v733_v32, %v732_v22 }
 0x1cf   :  { %v412_v50 = vpack.c.bf16 %v410_v46, %v409_v45 }
 0x1d0   :  { %v411_v51 = vpack.c.bf16 %v408_v49, %v407_v48  ;;  %v730_v41 = vmul.f32 %v1867_v18, %v727_v31 }
 0x1d1   :  { %2002 = vmatmul.mubr.msk.bf16.vlgmr.msra.gmra.mrb[4].mxu0 %vm189_vm2, %v2518_v47 }
 0x1d2   :  { %2011 = vmatprep.subr.bf16.mxu0 %v411_v51  ;;  %2015 = vmatprep.mubr.msk.bf16.mxu0 %vm189_vm2, %v2450_v16 }
 0x1d3   :  { %2012 = vmatpush3.bf16.msra.mxu0 %v411_v51 }
 0x1d4   :  { %2013 = vmatprep.subr.bf16.mxu0 %v412_v50 }
 0x1d7   :  { %2014 = vmatpush3.bf16.msra.mxu0 %v412_v50  ;;  %v2557_v50 = vadd.f32 %v734_v42, %v730_v41 }
 0x1d8   :  { %2161 = vmatprep.subr.msk.bf16.mxu0 %vm130_vm0, %v547_v53 }
 0x1d9   :  { %v760_v51 = vpack.c.bf16 %v2557_v50, %v2557_v50 }
 0x1da   :  { %2016 = vmatmul.mubr.msk.bf16.vlgmr.msra.gmra.mrb[8].mxu0 %vm189_vm2, %v2475_v60 }
 0x1db   :  { %2028 = vmatpush3.bf16.msra.mxu0 %v569_v54  ;;  %2029 = vmatprep.mubr.msk.bf16.mxu0 %vm123_vm1, %v2303_v5  ;;  %v782_v53 = vsel %vm130_vm0, %v760_v51, 0  ;;  %v2576_v54 = vpop.permute.xlu0 %763 }
 0x1dc   :  { %2041 = vmatprep.subr.bf16.mxu0 %v2223_v62 }
 0x1e2   :  { %2030 = vmatmul.mubr.msk.bf16.vlgmr.msra.gmra.mrb[12].mxu0 %vm123_vm1, %v2332_v13 }
 0x1e3   :  { %2045 = vmatprep.mubr.msk.bf16.mxu0 %vm2224_vm3, %v2223_v62 }
 0x2a4   :  { %v2539_v55 = vpop.f32.mrb[4].mxu0 }
 0x2a5   :  { %v2003_v56 = vpop.f32.mrb[5].mxu0 }
 0x2a6   :  { %v291_v57 = vpop.f32.mrb[6].mxu0  ;;  %v2578_v56 = vpop.permute.xlu0 %773 }
 0x2a7   :  { %v2004_v58 = vpop.f32.mrb[7].mxu0 }
 0x2aa   :  { %v2580_v57 = vpop.permute.xlu0 %976 }
 0x2ad   :  { %v2017_v59 = vpop.f32.mrb[8].mxu0 }
 0x2ae   :  { %v456_v61 = vadd.f32 %v2017_v59, %v2495_v2  ;;  %v447_v4 = vpop.f32.mrb[9].mxu0  ;;  %v2582_v58 = vpop.permute.xlu0 %986 }
 0x2af   :  { %v448_v14 = vadd.f32 %v447_v4, %v2491_v63  ;;  %v2018_v15 = vpop.f32.mrb[10].mxu0 }
 0x2b0   :  { %v459_v19 = vadd.f32 %v2018_v15, %v2497_v3  ;;  %v450_v20 = vpop.f32.mrb[11].mxu0  ;;  %v464_v27 = vmax.f32 %v456_v61, 0.0 }
 0x2b1   :  { %v451_v24 = vadd.f32 %v450_v20, %v2493_v1  ;;  %v462_v29 = vmax.f32 %v448_v14, 0.0  ;;  %v313_v14 = vsel %vm312_vm4, %v2465_v0, 0.0  ;;  %v526_v0 = vsel %vm312_vm4, %v2520_v52, 0.0 }
 0x2b2   :  { %v465_v28 = vmax.f32 %v459_v19, 0.0  ;;  %v2584_v59 = vpop.permute.xlu0 %1189  ;;  %v314_v15 = vrot.slane %v313_v14, 4  ;;  %v527_v31 = vrot.slane %v526_v0, 4 }
 0x2b3   :  { %v463_v7 = vmax.f32 %v451_v24, 0.0 }
 0x2b4   :  { %v467_v30 = vpack.c.bf16 %v465_v28, %v464_v27  ;;  %v315_v20 = vadd.f32 %v314_v15, %v313_v14  ;;  %v93_v28 = vld [vmem:[%s2852_s2] sm:$0x3] }
 0x2b5   :  { %v466_v10 = vpack.c.bf16 %v463_v7, %v462_v29  ;;  %v2031_v11 = vpop.f32.mrb[12].mxu0  ;;  %v309_v29 = vmul.f32 0.03, %v93_v28 }
 0x2b6   :  { %v614_v33 = vadd.f32 %v2031_v11, %v561_v9  ;;  %v605_v34 = vpop.f32.mrb[13].mxu0  ;;  %v2586_v61 = vpop.permute.xlu0 %1199  ;;  %v316_v21 = vrot.slane %v315_v20, 2  ;;  %v528_v11 = vadd.f32 %v527_v31, %v526_v0 }
 0x2b7   :  { %v606_v36 = vadd.f32 %v605_v34, %v551_v8  ;;  %2020 = vmatpush3.bf16.msra.mxu1 %v466_v10  ;;  %v2032_v37 = vpop.f32.mrb[14].mxu0 }
 0x2b8   :  { %v617_v38 = vadd.f32 %v2032_v37, %v566_v35  ;;  %v608_v39 = vpop.f32.mrb[15].mxu0  ;;  %2021 = vmatprep.subr.bf16.mxu1 %v2223_v62  ;;  %v622_v43 = vmax.f32 %v614_v33, 0.0  ;;  %v317_v24 = vadd.f32 %v316_v21, %v315_v20  ;;  %v529_v22 = vrot.slane %v528_v11, 2 }
 0x2b9   :  { %v609_v40 = vadd.f32 %v608_v39, %v556_v23  ;;  %v620_v45 = vmax.f32 %v606_v36, 0.0 }
 0x2ba   :  { %v623_v44 = vmax.f32 %v617_v38, 0.0  ;;  %v2588_v4 = vpop.permute.xlu0 %1402  ;;  %v318_v27 = vrot.slane %v317_v24, 1  ;;  %v530_v33 = vadd.f32 %v529_v22, %v528_v11 }
 0x2bb   :  { %v621_v46 = vmax.f32 %v609_v40, 0.0  ;;  %2022 = vmatpush3.bf16.msra.mxu1 %v467_v30 }
 0x2bc   :  { %v625_v48 = vpack.c.bf16 %v623_v44, %v622_v43  ;;  %v319_v30 = vadd.f32 %v318_v27, %v317_v24  ;;  %v531_v34 = vrot.slane %v530_v33, 1  ;;  %v939_v27 = vmul.f32 0.2, %v2557_v50 }
 0x2bd   :  { %v624_v49 = vpack.c.bf16 %v621_v46, %v620_v45 }
 0x2be   :  { %2024 = vmatmul.mubr.msk.bf16.vlgmr.msra.gmra.mrb[8].mxu1 %vm189_vm2, %v2518_v47  ;;  %v2590_v8 = vpop.permute.xlu0 %1412  ;;  %v320_v10 = vmul.f32 0.005, %v319_v30  ;;  %v532_v37 = vadd.f32 %v531_v34, %v530_v33  ;;  %v944_v30 = vmul.f32 0.00625, %v2557_v50 }
 0x2bf   :  { %2033 = vmatprep.subr.bf16.mxu1 %v624_v49  ;;  %2037 = vmatprep.mubr.msk.bf16.mxu1 %vm189_vm2, %v2450_v16 }
 0x2c0   :  { %2034 = vmatpush3.bf16.msra.mxu1 %v624_v49  ;;  %v533_v43 = vmul.f32 0.005, %v532_v37 }
 0x2c1   :  { %2035 = vmatprep.subr.bf16.mxu1 %v625_v48 }
 0x2c2   :  { %v2594_v19 = vpop.permute.xlu0 %1615 }
 0x2c4   :  { %2036 = vmatpush3.bf16.msra.mxu1 %v625_v48 }
 0x2c5   :  { %2162 = vmatprep.subr.msk.bf16.mxu1 %vm130_vm0, %v760_v51 }
 0x2c6   :  { %v2596_v23 = vpop.permute.xlu0 %1625 }
 0x2c7   :  { %2038 = vmatmul.mubr.msk.bf16.vlgmr.msra.gmra.mrb[12].mxu1 %vm189_vm2, %v2475_v60 }
 0x2c8   :  { %2050 = vmatpush3.bf16.msra.mxu1 %v782_v53  ;;  %2051 = vmatprep.mubr.msk.bf16.mxu1 %vm123_vm1, %v2303_v5 }
 0x2c9   :  { %2063 = vmatprep.subr.bf16.mxu1 %v2223_v62 }
 0x2ca   :  { %v2598_v25 = vpop.permute.xlu0 %89 }
 0x2cb   :  { %v289_v26 = vadd.f32 %v2539_v55, %v2598_v25 }
 0x2cd   :  { %v310_v7 = vmul.f32 0.1, %v289_v26  ;;  %v324_v35 = vmul.f32 %v2457_v17, %v289_v26  ;;  %v2613_v17 = vld [vmem:[%s2850_s0 + $0x3] ss:$0 sm:$0xff] }
 0x2ce   :  { %v946_v34 = vmul.f32 %v2613_v17, %v939_v27 }
 0x2cf   :  { %2052 = vmatmul.mubr.msk.bf16.vlgmr.msra.gmra.mrb[16].mxu1 %vm123_vm1, %v2332_v13  ;;  %v311_v9 = vadd.f32 %v310_v7, %v309_v29  ;;  %v941_v7 = vmul.f32 %v2613_v17, %v2613_v17 }
 0x2d0   :  { %2067 = vmatprep.mubr.msk.bf16.mxu1 %vm2224_vm3, %v2223_v62 }
 0x2d1   :  { %v321_v18 = vadd.f32 %v320_v10, %v311_v9  ;;  %v1874_v33 = vadd.f32 -0.125, %v941_v7 }
 0x2d3   :  { %v322_v32 = vmul.f32 0.125, %v321_v18  ;;  %v940_v18 = vmul.f32 0.1, %v939_v27 }
 0x2d5   :  { %v323_v55 = vsub.f32 %v93_v28, %v322_v32  ;;  %v769_v28 = vpop.permute.xlu1 %768 }
 0x2d7   :  { %v325_v36 = vadd.f32 %v324_v35, %v323_v55  ;;  %v945_v55 = vadd.f32 %v944_v30, %v2557_v50 }
 0x2d9   :  { %v523_v40 = vmul.f32 0.03, %v325_v36  ;;  %v779_v37 = vpop.permute.xlu1 %778 }
 0x391   :  { %v502_v38 = vpop.f32.mrb[8].mxu1 }
 0x392   :  { %v503_v52 = vadd.f32 %v502_v38, %v2598_v25  ;;  %v2025_v39 = vpop.f32.mrb[9].mxu1 }
 0x393   :  { %v505_v41 = vpop.f32.mrb[10].mxu1 }
 0x394   :  { %v524_v42 = vmul.f32 0.1, %v503_v52  ;;  %v2026_v44 = vpop.f32.mrb[11].mxu1  ;;  %v537_v15 = vmul.f32 %v2503_v12, %v503_v52 }
 0x396   :  { %v525_v45 = vadd.f32 %v524_v42, %v523_v40  ;;  %v943_v42 = vmul.f32 %v1874_v33, %v940_v18 }
 0x398   :  { %v534_v46 = vadd.f32 %v533_v43, %v525_v45  ;;  %v947_v43 = vadd.f32 %v946_v34, %v945_v55  ;;  %v2657_v55 = vld [vmem:[%s2850_s0 + $0x4] ss:$0 sm:$0xff] }
 0x39a   :  { %v535_v48 = vmul.f32 0.125, %v534_v46  ;;  %v2039_v49 = vpop.f32.mrb[12].mxu1 }
 0x39b   :  { %v669_v51 = vadd.f32 %v2039_v49, %v2495_v2  ;;  %v660_v53 = vpop.f32.mrb[13].mxu1 }
 0x39c   :  { %v536_v14 = vsub.f32 %v325_v36, %v535_v48  ;;  %v661_v20 = vadd.f32 %v660_v53, %v2491_v63  ;;  %v2040_v21 = vpop.f32.mrb[14].mxu1 }
 0x39d   :  { %v672_v24 = vadd.f32 %v2040_v21, %v2497_v3  ;;  %v663_v26 = vpop.f32.mrb[15].mxu1  ;;  %v677_v31 = vmax.f32 %v669_v51, 0.0  ;;  %v2630_v51 = vadd.f32 %v947_v43, %v943_v42  ;;  %v1154_v43 = vmul.f32 %v2657_v55, %v2657_v55 }
 0x39e   :  { %v2619_v0 = vadd.f32 %v537_v15, %v536_v14  ;;  %v664_v29 = vadd.f32 %v663_v26, %v2493_v1  ;;  %v675_v9 = vmax.f32 %v661_v20, 0.0  ;;  %v739_v14 = vsel %vm312_vm4, %v2557_v50, 0.0 }
 0x39f   :  { %v678_v12 = vmax.f32 %v672_v24, 0.0  ;;  %v740_v15 = vrot.slane %v739_v14, 4 }
 0x3a0   :  { %v676_v10 = vmax.f32 %v664_v29, 0.0  ;;  %v736_v30 = vmul.f32 0.03, %v2619_v0 }
 0x3a1   :  { %v680_v11 = vpack.c.bf16 %v678_v12, %v677_v31  ;;  %v741_v20 = vadd.f32 %v740_v15, %v739_v14 }
 0x3a2   :  { %v679_v22 = vpack.c.bf16 %v676_v10, %v675_v9  ;;  %v2053_v32 = vpop.f32.mrb[16].mxu1 }
 0x3a3   :  { %v827_v35 = vadd.f32 %v2053_v32, %v2578_v56  ;;  %v818_v36 = vpop.f32.mrb[17].mxu1  ;;  %v742_v21 = vrot.slane %v741_v20, 2 }
 0x3a4   :  { %v819_v38 = vadd.f32 %v818_v36, %v2576_v54  ;;  %2042 = vmatpush3.bf16.msra.mxu0 %v679_v22  ;;  %v2054_v52 = vpop.f32.mrb[18].mxu1  ;;  %v973_v54 = vpack.c.bf16 %v2630_v51, %v2630_v51 }
 0x3a5   :  { %v830_v39 = vadd.f32 %v2054_v52, %v779_v37  ;;  %v821_v40 = vpop.f32.mrb[19].mxu1  ;;  %2043 = vmatprep.subr.bf16.mxu0 %v2223_v62  ;;  %v835_v44 = vmax.f32 %v827_v35, 0.0  ;;  %v743_v24 = vadd.f32 %v742_v21, %v741_v20 }
 0x3a6   :  { %v822_v41 = vadd.f32 %v821_v40, %v769_v28  ;;  %v833_v46 = vmax.f32 %v819_v38, 0.0  ;;  %v995_v53 = vsel %vm130_vm0, %v973_v54, 0  ;;  %v982_v40 = vpop.permute.xlu1 %981 }
 0x3a7   :  { %v836_v45 = vmax.f32 %v830_v39, 0.0  ;;  %v744_v26 = vrot.slane %v743_v24, 1  ;;  %v1152_v39 = vmul.f32 0.2, %v2630_v51 }
 0x3a8   :  { %v834_v48 = vmax.f32 %v822_v41, 0.0  ;;  %2044 = vmatpush3.bf16.msra.mxu0 %v680_v11 }
 0x3a9   :  { %v838_v49 = vpack.c.bf16 %v836_v45, %v835_v44  ;;  %v745_v27 = vadd.f32 %v744_v26, %v743_v24  ;;  %v1159_v15 = vmul.f32 %v2657_v55, %v1152_v39 }
 0x3aa   :  { %v837_v56 = vpack.c.bf16 %v834_v48, %v833_v46  ;;  %v992_v24 = vpop.permute.xlu1 %991 }
 0x3ab   :  { %2046 = vmatmul.mubr.msk.bf16.vlgmr.msra.gmra.mrb[16].mxu0 %vm189_vm2, %v2518_v47  ;;  %v746_v9 = vmul.f32 0.005, %v745_v27 }
 0x3ac   :  { %2055 = vmatprep.subr.bf16.mxu0 %v837_v56  ;;  %2059 = vmatprep.mubr.msk.bf16.mxu0 %vm189_vm2, %v2450_v16 }
 0x3ad   :  { %2056 = vmatpush3.bf16.msra.mxu0 %v837_v56 }
 0x3ae   :  { %2057 = vmatprep.subr.bf16.mxu0 %v838_v49 }
 0x3b1   :  { %2058 = vmatpush3.bf16.msra.mxu0 %v838_v49  ;;  %v1153_v49 = vmul.f32 0.1, %v1152_v39 }
 0x3b2   :  { %2163 = vmatprep.subr.msk.bf16.mxu0 %vm130_vm0, %v973_v54 }
 0x3b4   :  { %2060 = vmatmul.mubr.msk.bf16.vlgmr.msra.gmra.mrb[20].mxu0 %vm189_vm2, %v2475_v60 }
 0x3b5   :  { %2072 = vmatpush3.bf16.msra.mxu0 %v995_v53  ;;  %2073 = vmatprep.mubr.msk.bf16.mxu0 %vm123_vm1, %v2303_v5  ;;  %v1881_v53 = vadd.f32 -0.125, %v1154_v43 }
 0x3b6   :  { %2085 = vmatprep.subr.bf16.mxu0 %v2223_v62 }
 0x3bc   :  { %2074 = vmatmul.mubr.msk.bf16.vlgmr.msra.gmra.mrb[24].mxu0 %vm123_vm1, %v2332_v13 }
 0x3bd   :  { %2089 = vmatprep.mubr.msk.bf16.mxu0 %vm2224_vm3, %v2223_v62 }
 0x47e   :  { %v715_v28 = vpop.f32.mrb[16].mxu0 }
 0x47f   :  { %v716_v29 = vadd.f32 %v715_v28, %v2598_v25  ;;  %v2047_v7 = vpop.f32.mrb[17].mxu0 }
 0x480   :  { %v718_v31 = vpop.f32.mrb[18].mxu0 }
 0x481   :  { %v737_v12 = vmul.f32 0.1, %v716_v29  ;;  %v2048_v10 = vpop.f32.mrb[19].mxu0  ;;  %v750_v35 = vmul.f32 %v2545_v6, %v716_v29 }
 0x483   :  { %v738_v11 = vadd.f32 %v737_v12, %v736_v30  ;;  %v1156_v30 = vmul.f32 %v1881_v53, %v1153_v49 }
 0x485   :  { %v747_v18 = vadd.f32 %v746_v9, %v738_v11 }
 0x487   :  { %v748_v22 = vmul.f32 0.125, %v747_v18  ;;  %v2061_v50 = vpop.f32.mrb[20].mxu0 }
 0x488   :  { %v882_v32 = vadd.f32 %v2061_v50, %v2495_v2  ;;  %v873_v33 = vpop.f32.mrb[21].mxu0 }
 0x489   :  { %v749_v34 = vsub.f32 %v2619_v0, %v748_v22  ;;  %v874_v36 = vadd.f32 %v873_v33, %v2491_v63  ;;  %v2062_v37 = vpop.f32.mrb[22].mxu0  ;;  %v1157_v0 = vmul.f32 0.00625, %v2630_v51 }
 0x48a   :  { %v885_v38 = vadd.f32 %v2062_v37, %v2497_v3  ;;  %v876_v52 = vpop.f32.mrb[23].mxu0  ;;  %v890_v44 = vmax.f32 %v882_v32, 0.0  ;;  %v952_v32 = vsel %vm312_vm4, %v2630_v51, 0.0 }
 0x48b   :  { %v2664_v41 = vadd.f32 %v750_v35, %v749_v34  ;;  %v877_v42 = vadd.f32 %v876_v52, %v2493_v1  ;;  %v888_v45 = vmax.f32 %v874_v36, 0.0  ;;  %v1158_v14 = vadd.f32 %v1157_v0, %v2630_v51 }
 0x48c   :  { %v891_v6 = vmax.f32 %v885_v38, 0.0  ;;  %v953_v33 = vrot.slane %v952_v32, 4 }
 0x48d   :  { %v889_v46 = vmax.f32 %v877_v42, 0.0  ;;  %v1160_v31 = vadd.f32 %v1159_v15, %v1158_v14  ;;  %v949_v42 = vmul.f32 0.03, %v2664_v41 }
 0x48e   :  { %v893_v48 = vpack.c.bf16 %v891_v6, %v890_v44  ;;  %v954_v34 = vadd.f32 %v953_v33, %v952_v32 }
 0x48f   :  { %v892_v56 = vpack.c.bf16 %v889_v46, %v888_v45  ;;  %v2075_v54 = vpop.f32.mrb[24].mxu0  ;;  %v2675_v22 = vadd.f32 %v1160_v31, %v1156_v30 }
 0x490   :  { %v1040_v20 = vadd.f32 %v2075_v54, %v2582_v58  ;;  %v1031_v21 = vpop.f32.mrb[25].mxu0  ;;  %v955_v35 = vrot.slane %v954_v34, 2  ;;  %v2702_v54 = vld [vmem:[%s2850_s0 + $0x5] ss:$0 sm:$0xff] }
 0x491   :  { %v1032_v26 = vadd.f32 %v1031_v21, %v2580_v57  ;;  %2064 = vmatpush3.bf16.msra.mxu1 %v892_v56  ;;  %v2076_v27 = vpop.f32.mrb[26].mxu0  ;;  %v1186_v57 = vpack.c.bf16 %v2675_v22, %v2675_v22 }
 0x492   :  { %v1043_v28 = vadd.f32 %v2076_v27, %v992_v24  ;;  %v1034_v29 = vpop.f32.mrb[27].mxu0  ;;  %2065 = vmatprep.subr.bf16.mxu1 %v2223_v62  ;;  %v1048_v12 = vmax.f32 %v1040_v20, 0.0  ;;  %v956_v36 = vadd.f32 %v955_v35, %v954_v34  ;;  %v1195_v27 = vpop.permute.xlu1 %1194 }
 0x493   :  { %v1035_v7 = vadd.f32 %v1034_v29, %v982_v40  ;;  %v1046_v10 = vmax.f32 %v1032_v26, 0.0  ;;  %v1208_v50 = vsel %vm130_vm0, %v1186_v57, 0  ;;  %v1365_v26 = vmul.f32 0.2, %v2675_v22 }
 0x494   :  { %v1049_v9 = vmax.f32 %v1043_v28, 0.0  ;;  %v957_v37 = vrot.slane %v956_v36, 1 }
 0x495   :  { %v1047_v11 = vmax.f32 %v1035_v7, 0.0  ;;  %2066 = vmatpush3.bf16.msra.mxu1 %v893_v48  ;;  %v1367_v7 = vmul.f32 %v2702_v54, %v2702_v54 }
 0x496   :  { %v1051_v18 = vpack.c.bf16 %v1049_v9, %v1048_v12  ;;  %v958_v38 = vadd.f32 %v957_v37, %v956_v36  ;;  %v1205_v34 = vpop.permute.xlu1 %1204 }
 0x497   :  { %v1050_v58 = vpack.c.bf16 %v1047_v11, %v1046_v10  ;;  %v1366_v10 = vmul.f32 0.1, %v1365_v26 }
 0x498   :  { %2068 = vmatmul.mubr.msk.bf16.vlgmr.msra.gmra.mrb[20].mxu1 %vm189_vm2, %v2518_v47  ;;  %v959_v44 = vmul.f32 0.005, %v958_v38 }
 0x499   :  { %2077 = vmatprep.subr.bf16.mxu1 %v1050_v58  ;;  %2081 = vmatprep.mubr.msk.bf16.mxu1 %vm189_vm2, %v2450_v16 }
 0x49a   :  { %2078 = vmatpush3.bf16.msra.mxu1 %v1050_v58  ;;  %v1888_v58 = vadd.f32 -0.125, %v1367_v7 }
 0x49b   :  { %2079 = vmatprep.subr.bf16.mxu1 %v1051_v18 }
 0x49e   :  { %2080 = vmatpush3.bf16.msra.mxu1 %v1051_v18 }
 0x49f   :  { %2164 = vmatprep.subr.msk.bf16.mxu1 %vm130_vm0, %v1186_v57 }
 0x4a1   :  { %2082 = vmatmul.mubr.msk.bf16.vlgmr.msra.gmra.mrb[24].mxu1 %vm189_vm2, %v2475_v60 }
 0x4a2   :  { %2094 = vmatpush3.bf16.msra.mxu1 %v1208_v50  ;;  %2095 = vmatprep.mubr.msk.bf16.mxu1 %vm123_vm1, %v2303_v5  ;;  %v1372_v50 = vmul.f32 %v2702_v54, %v1365_v26 }
 0x4a3   :  { %2107 = vmatprep.subr.bf16.mxu1 %v2223_v62 }
 0x4a9   :  { %2096 = vmatmul.mubr.msk.bf16.vlgmr.msra.gmra.mrb[28].mxu1 %vm123_vm1, %v2332_v13 }
 0x4aa   :  { %2111 = vmatprep.mubr.msk.bf16.mxu1 %vm2224_vm3, %v2223_v62 }
 0x56b   :  { %v928_v52 = vpop.f32.mrb[20].mxu1 }
 0x56c   :  { %v929_v39 = vadd.f32 %v928_v52, %v2598_v25  ;;  %v2069_v40 = vpop.f32.mrb[21].mxu1 }
 0x56d   :  { %v931_v43 = vpop.f32.mrb[22].mxu1 }
 0x56e   :  { %v950_v0 = vmul.f32 0.1, %v929_v39  ;;  %v2070_v6 = vpop.f32.mrb[23].mxu1  ;;  %v963_v14 = vmul.f32 %v2613_v17, %v929_v39  ;;  %v1369_v39 = vmul.f32 %v1888_v58, %v1366_v10  ;;  %v2747_v10 = vld [vmem:[%s2850_s0 + $0x6] ss:$0 sm:$0xff] }
 0x570   :  { %v951_v45 = vadd.f32 %v950_v0, %v949_v42 }
 0x572   :  { %v960_v46 = vadd.f32 %v959_v44, %v951_v45 }
 0x574   :  { %v961_v48 = vmul.f32 0.125, %v960_v46  ;;  %v2083_v51 = vpop.f32.mrb[24].mxu1 }
 0x575   :  { %v1095_v49 = vadd.f32 %v2083_v51, %v2495_v2  ;;  %v1086_v56 = vpop.f32.mrb[25].mxu1 }
 0x576   :  { %v962_v53 = vsub.f32 %v2664_v41, %v961_v48  ;;  %v1087_v15 = vadd.f32 %v1086_v56, %v2491_v63  ;;  %v2084_v20 = vpop.f32.mrb[26].mxu1  ;;  %v1370_v41 = vmul.f32 0.00625, %v2675_v22  ;;  %v1165_v48 = vsel %vm312_vm4, %v2675_v22, 0.0 }
 0x577   :  { %v1098_v21 = vadd.f32 %v2084_v20, %v2497_v3  ;;  %v1089_v24 = vpop.f32.mrb[27].mxu1  ;;  %v1103_v30 = vmax.f32 %v1095_v49, 0.0  ;;  %v1166_v51 = vrot.slane %v1165_v48, 4 }
 0x578   :  { %v2709_v28 = vadd.f32 %v963_v14, %v962_v53  ;;  %v1090_v29 = vadd.f32 %v1089_v24, %v2493_v1  ;;  %v1101_v31 = vmax.f32 %v1087_v15, 0.0  ;;  %v1371_v57 = vadd.f32 %v1370_v41, %v2675_v22 }
 0x579   :  { %v1104_v17 = vmax.f32 %v1098_v21, 0.0  ;;  %v1167_v49 = vadd.f32 %v1166_v51, %v1165_v48 }
 0x57a   :  { %v1102_v12 = vmax.f32 %v1090_v29, 0.0  ;;  %v1373_v40 = vadd.f32 %v1372_v50, %v1371_v57  ;;  %v1162_v26 = vmul.f32 0.03, %v2709_v28 }
 0x57b   :  { %v1106_v9 = vpack.c.bf16 %v1104_v17, %v1103_v30  ;;  %v1168_v56 = vrot.slane %v1167_v49, 2 }
 0x57c   :  { %v1105_v11 = vpack.c.bf16 %v1102_v12, %v1101_v31  ;;  %v2097_v18 = vpop.f32.mrb[28].mxu1  ;;  %v2720_v45 = vadd.f32 %v1373_v40, %v1369_v39 }
 0x57d   :  { %v1253_v32 = vadd.f32 %v2097_v18, %v2586_v61  ;;  %v1244_v33 = vpop.f32.mrb[29].mxu1  ;;  %v1169_v53 = vadd.f32 %v1168_v56, %v1167_v49 }
 0x57e   :  { %v1245_v35 = vadd.f32 %v1244_v33, %v2584_v59  ;;  %2086 = vmatpush3.bf16.msra.mxu0 %v1105_v11  ;;  %v2098_v36 = vpop.f32.mrb[30].mxu1  ;;  %v1399_v59 = vpack.c.bf16 %v2720_v45, %v2720_v45  ;;  %v1578_v33 = vmul.f32 0.2, %v2720_v45 }
 0x57f   :  { %v1256_v37 = vadd.f32 %v2098_v36, %v1205_v34  ;;  %v1247_v38 = vpop.f32.mrb[31].mxu1  ;;  %2087 = vmatprep.subr.bf16.mxu0 %v2223_v62  ;;  %v1261_v42 = vmax.f32 %v1253_v32, 0.0  ;;  %v1170_v14 = vrot.slane %v1169_v53, 1  ;;  %v1408_v34 = vpop.permute.xlu1 %1407 }
 0x580   :  { %v1248_v52 = vadd.f32 %v1247_v38, %v1195_v27  ;;  %v1259_v0 = vmax.f32 %v1245_v35, 0.0  ;;  %v1421_v46 = vsel %vm130_vm0, %v1399_v59, 0 }
 0x581   :  { %v1262_v43 = vmax.f32 %v1256_v37, 0.0  ;;  %v1171_v15 = vadd.f32 %v1170_v14, %v1169_v53  ;;  %v1580_v37 = vmul.f32 %v2747_v10, %v2747_v10 }
 0x582   :  { %v1260_v44 = vmax.f32 %v1248_v52, 0.0  ;;  %2088 = vmatpush3.bf16.msra.mxu0 %v1106_v9 }
 0x583   :  { %v1264_v6 = vpack.c.bf16 %v1262_v43, %v1261_v42  ;;  %v1172_v7 = vmul.f32 0.005, %v1171_v15  ;;  %v1579_v42 = vmul.f32 0.1, %v1578_v33  ;;  %v1418_v48 = vpop.permute.xlu1 %1417 }
 0x584   :  { %v1263_v61 = vpack.c.bf16 %v1260_v44, %v1259_v0  ;;  %v1895_v44 = vadd.f32 -0.125, %v1580_v37 }
 0x585   :  { %2090 = vmatmul.mubr.msk.bf16.vlgmr.msra.gmra.mrb[28].mxu0 %vm189_vm2, %v2518_v47 }
 0x586   :  { %2099 = vmatprep.subr.bf16.mxu0 %v1263_v61  ;;  %2103 = vmatprep.mubr.msk.bf16.mxu0 %vm189_vm2, %v2450_v16  ;;  %v1582_v15 = vmul.f32 %v1895_v44, %v1579_v42 }
 0x587   :  { %2100 = vmatpush3.bf16.msra.mxu0 %v1263_v61  ;;  %v1585_v61 = vmul.f32 %v2747_v10, %v1578_v33 }
 0x588   :  { %2101 = vmatprep.subr.bf16.mxu0 %v1264_v6 }
 0x58b   :  { %2102 = vmatpush3.bf16.msra.mxu0 %v1264_v6 }
 0x58c   :  { %2165 = vmatprep.subr.msk.bf16.mxu0 %vm130_vm0, %v1399_v59 }
 0x58e   :  { %2104 = vmatmul.mubr.msk.bf16.vlgmr.msra.gmra.mrb[32].mxu0 %vm189_vm2, %v2475_v60 }
 0x58f   :  { %2116 = vmatpush3.bf16.msra.mxu0 %v1421_v46  ;;  %2117 = vmatprep.mubr.msk.bf16.mxu0 %vm123_vm1, %v2303_v5 }
 0x590   :  { %2129 = vmatprep.subr.bf16.mxu0 %v2223_v62 }
 0x596   :  { %2118 = vmatmul.mubr.msk.bf16.vlgmr.msra.gmra.mrb[36].mxu0 %vm123_vm1, %v2332_v13 }
 0x597   :  { %2133 = vmatprep.mubr.msk.bf16.mxu0 %vm2224_vm3, %v2223_v62 }
 0x658   :  { %v1141_v20 = vpop.f32.mrb[28].mxu0 }
 0x659   :  { %v1142_v21 = vadd.f32 %v1141_v20, %v2598_v25  ;;  %v2091_v24 = vpop.f32.mrb[29].mxu0 }
 0x65a   :  { %v1144_v27 = vpop.f32.mrb[30].mxu0 }
 0x65b   :  { %v1163_v29 = vmul.f32 0.1, %v1142_v21  ;;  %v2092_v41 = vpop.f32.mrb[31].mxu0  ;;  %v1176_v18 = vmul.f32 %v2657_v55, %v1142_v21 }
 0x65d   :  { %v1164_v30 = vadd.f32 %v1163_v29, %v1162_v26 }
 0x65f   :  { %v1173_v17 = vadd.f32 %v1172_v7, %v1164_v30  ;;  %v1378_v30 = vsel %vm312_vm4, %v2720_v45, 0.0 }
 0x661   :  { %v1174_v31 = vmul.f32 0.125, %v1173_v17  ;;  %v2105_v22 = vpop.f32.mrb[32].mxu0  ;;  %v1379_v17 = vrot.slane %v1378_v30, 4 }
 0x662   :  { %v1308_v12 = vadd.f32 %v2105_v22, %v2495_v2  ;;  %v1299_v9 = vpop.f32.mrb[33].mxu0 }
 0x663   :  { %v1175_v11 = vsub.f32 %v2709_v28, %v1174_v31  ;;  %v1300_v58 = vadd.f32 %v1299_v9, %v2491_v63  ;;  %v2106_v57 = vpop.f32.mrb[34].mxu0  ;;  %v1583_v28 = vmul.f32 0.00625, %v2720_v45  ;;  %v1380_v31 = vadd.f32 %v1379_v17, %v1378_v30 }
 0x664   :  { %v1311_v50 = vadd.f32 %v2106_v57, %v2497_v3  ;;  %v1302_v32 = vpop.f32.mrb[35].mxu0  ;;  %v1316_v38 = vmax.f32 %v1308_v12, 0.0 }
 0x665   :  { %v2754_v35 = vadd.f32 %v1176_v18, %v1175_v11  ;;  %v1303_v36 = vadd.f32 %v1302_v32, %v2493_v1  ;;  %v1314_v52 = vmax.f32 %v1300_v58, 0.0  ;;  %v1584_v6 = vadd.f32 %v1583_v28, %v2720_v45 }
 0x666   :  { %v1317_v55 = vmax.f32 %v1311_v50, 0.0  ;;  %v1381_v22 = vrot.slane %v1380_v31, 2 }
 0x667   :  { %v1315_v39 = vmax.f32 %v1303_v36, 0.0  ;;  %v1586_v20 = vadd.f32 %v1585_v61, %v1584_v6  ;;  %v1375_v57 = vmul.f32 0.03, %v2754_v35 }
 0x668   :  { %v1319_v40 = vpack.c.bf16 %v1317_v55, %v1316_v38  ;;  %v1382_v12 = vadd.f32 %v1381_v22, %v1380_v31 }
 0x669   :  { %v1318_v43 = vpack.c.bf16 %v1315_v39, %v1314_v52  ;;  %v2119_v0 = vpop.f32.mrb[36].mxu0  ;;  %v2765_v7 = vadd.f32 %v1586_v20, %v1582_v15 }
 0x66a   :  { %v1466_v59 = vadd.f32 %v2119_v0, %v2590_v8  ;;  %v1457_v46 = vpop.f32.mrb[37].mxu0  ;;  %v1383_v9 = vrot.slane %v1382_v12, 1  ;;  %v1621_v0 = vpop.permute.xlu1 %1620 }
 0x66b   :  { %v1458_v51 = vadd.f32 %v1457_v46, %v2588_v4  ;;  %2108 = vmatpush3.bf16.msra.mxu1 %v1318_v43  ;;  %v2120_v49 = vpop.f32.mrb[38].mxu0  ;;  %v1612_v4 = vpack.c.bf16 %v2765_v7, %v2765_v7 }
 0x66c   :  { %v1469_v56 = vadd.f32 %v2120_v49, %v1418_v48  ;;  %v1460_v53 = vpop.f32.mrb[39].mxu0  ;;  %2109 = vmatprep.subr.bf16.mxu1 %v2223_v62  ;;  %v1474_v21 = vmax.f32 %v1466_v59, 0.0  ;;  %v1384_v11 = vadd.f32 %v1383_v9, %v1382_v12 }
 0x66d   :  { %v1461_v14 = vadd.f32 %v1460_v53, %v1408_v34  ;;  %v1472_v26 = vmax.f32 %v1458_v51, 0.0  ;;  %v1634_v41 = vsel %vm130_vm0, %v1612_v4, 0 }
 0x66e   :  { %v1475_v24 = vmax.f32 %v1469_v56, 0.0  ;;  %v1385_v32 = vmul.f32 0.005, %v1384_v11  ;;  %v1631_v53 = vpop.permute.xlu1 %1630 }
 0x66f   :  { %v1473_v27 = vmax.f32 %v1461_v14, 0.0  ;;  %2110 = vmatpush3.bf16.msra.mxu1 %v1319_v40 }
 0x670   :  { %v1477_v29 = vpack.c.bf16 %v1475_v24, %v1474_v21 }
 0x671   :  { %v1476_v8 = vpack.c.bf16 %v1473_v27, %v1472_v26 }
 0x672   :  { %2112 = vmatmul.mubr.msk.bf16.vlgmr.msra.gmra.mrb[32].mxu1 %vm189_vm2, %v2518_v47 }
 0x673   :  { %2121 = vmatprep.subr.bf16.mxu1 %v1476_v8  ;;  %2125 = vmatprep.mubr.msk.bf16.mxu1 %vm189_vm2, %v2450_v16 }
 0x674   :  { %2122 = vmatpush3.bf16.msra.mxu1 %v1476_v8 }
 0x675   :  { %2123 = vmatprep.subr.bf16.mxu1 %v1477_v29 }
 0x678   :  { %2124 = vmatpush3.bf16.msra.mxu1 %v1477_v29 }
 0x679   :  { %2166 = vmatprep.subr.msk.bf16.mxu1 %vm130_vm0, %v1612_v4 }
 0x67b   :  { %2126 = vmatmul.mubr.msk.bf16.vlgmr.msra.gmra.mrb[36].mxu1 %vm189_vm2, %v2475_v60 }
 0x67c   :  { %2138 = vmatpush3.bf16.msra.mxu1 %v1634_v41  ;;  %2139 = vmatprep.mubr.msk.bf16.mxu1 %vm123_vm1, %v2303_v5 }
 0x67d   :  { %2151 = vmatprep.subr.bf16.mxu1 %v2223_v62 }
 0x683   :  { %2140 = vmatmul.mubr.msk.bf16.vlgmr.msra.gmra.mrb[40].mxu1 %vm123_vm1, %v2332_v13 }
 0x684   :  { %2155 = vmatprep.mubr.msk.bf16.mxu1 %vm2224_vm3, %v2223_v62 }
 0x745   :  { %v1354_v18 = vpop.f32.mrb[32].mxu1 }
 0x746   :  { %v1355_v5 = vadd.f32 %v1354_v18, %v2598_v25  ;;  %v2113_v58 = vpop.f32.mrb[33].mxu1 }
 0x747   :  { %v1357_v50 = vpop.f32.mrb[34].mxu1 }
 0x748   :  { %v1376_v13 = vmul.f32 0.1, %v1355_v5  ;;  %v2114_v33 = vpop.f32.mrb[35].mxu1  ;;  %v1389_v52 = vmul.f32 %v2702_v54, %v1355_v5 }
 0x74a   :  { %v1377_v34 = vadd.f32 %v1376_v13, %v1375_v57 }
 0x74c   :  { %v1386_v36 = vadd.f32 %v1385_v32, %v1377_v34 }
 0x74e   :  { %v1387_v37 = vmul.f32 0.125, %v1386_v36  ;;  %v2127_v45 = vpop.f32.mrb[36].mxu1 }
 0x74f   :  { %v1521_v28 = vadd.f32 %v2127_v45, %v2495_v2  ;;  %v1512_v38 = vpop.f32.mrb[37].mxu1 }
 0x750   :  { %v1388_v55 = vsub.f32 %v2754_v35, %v1387_v37  ;;  %v1513_v39 = vadd.f32 %v1512_v38, %v2491_v63  ;;  %v2128_v40 = vpop.f32.mrb[38].mxu1 }
 0x751   :  { %v1524_v42 = vadd.f32 %v2128_v40, %v2497_v3  ;;  %v1515_v43 = vpop.f32.mrb[39].mxu1  ;;  %v1529_v61 = vmax.f32 %v1521_v28, 0.0 }
 0x752   :  { %v1390_v44 = vadd.f32 %v1389_v52, %v1388_v55  ;;  %v1516_v6 = vadd.f32 %v1515_v43, %v2493_v1  ;;  %v1527_v46 = vmax.f32 %v1513_v39, 0.0 }
 0x753   :  { %v1530_v59 = vmax.f32 %v1524_v42, 0.0 }
 0x754   :  { %v1528_v48 = vmax.f32 %v1516_v6, 0.0 }
 0x755   :  { %v1532_v51 = vpack.c.bf16 %v1530_v59, %v1529_v61 }
 0x756   :  { %v1531_v49 = vpack.c.bf16 %v1528_v48, %v1527_v46  ;;  %v2141_v56 = vpop.f32.mrb[40].mxu1 }
 0x757   :  { %v1679_v35 = vadd.f32 %v2141_v56, %v2596_v23  ;;  %v1670_v54 = vpop.f32.mrb[41].mxu1 }
 0x758   :  { %v1671_v14 = vadd.f32 %v1670_v54, %v2594_v19  ;;  %2130 = vmatpush3.bf16.msra.mxu0 %v1531_v49  ;;  %v2142_v15 = vpop.f32.mrb[42].mxu1  ;;  %v1591_v19 = vsel %vm312_vm4, %v2765_v7, 0.0 }
 0x759   :  { %v1682_v20 = vadd.f32 %v2142_v15, %v1631_v53  ;;  %v1673_v21 = vpop.f32.mrb[43].mxu1  ;;  %2131 = vmatprep.subr.bf16.mxu0 %v2223_v62  ;;  %v1687_v26 = vmax.f32 %v1679_v35, 0.0  ;;  %v1592_v23 = vrot.slane %v1591_v19, 4 }
 0x75a   :  { %v1674_v24 = vadd.f32 %v1673_v21, %v1621_v0  ;;  %v1685_v29 = vmax.f32 %v1671_v14, 0.0 }
 0x75b   :  { %v1688_v27 = vmax.f32 %v1682_v20, 0.0  ;;  %v1593_v30 = vadd.f32 %v1592_v23, %v1591_v19 }
 0x75c   :  { %v1686_v8 = vmax.f32 %v1674_v24, 0.0  ;;  %2132 = vmatpush3.bf16.msra.mxu0 %v1532_v51 }
 0x75d   :  { %v1690_v4 = vpack.c.bf16 %v1688_v27, %v1687_v26  ;;  %v1594_v17 = vrot.slane %v1593_v30, 2 }
 0x75e   :  { %v1689_v41 = vpack.c.bf16 %v1686_v8, %v1685_v29 }
 0x75f   :  { %2134 = vmatmul.mubr.msk.bf16.vlgmr.msra.gmra.mrb[40].mxu0 %vm189_vm2, %v2518_v47  ;;  %v1595_v31 = vadd.f32 %v1594_v17, %v1593_v30 }
 0x760   :  { %2143 = vmatprep.subr.bf16.mxu0 %v1689_v41  ;;  %2147 = vmatprep.mubr.msk.bf16.mxu0 %vm189_vm2, %v2450_v16  ;;  %v1588_v16 = vmul.f32 0.03, %v1390_v44 }
 0x761   :  { %2144 = vmatpush3.bf16.msra.mxu0 %v1689_v41  ;;  %v1596_v22 = vrot.slane %v1595_v31, 1 }
 0x762   :  { %2145 = vmatprep.subr.bf16.mxu0 %v1690_v4 }
 0x763   :  { %v1597_v12 = vadd.f32 %v1596_v22, %v1595_v31 }
 0x765   :  { %2146 = vmatpush3.bf16.msra.mxu0 %v1690_v4  ;;  %v1598_v57 = vmul.f32 0.005, %v1597_v12 }
 0x768   :  { %2148 = vmatmul.mubr.msk.bf16.vlgmr.msra.gmra.mrb[44].mxu0 %vm189_vm2, %v2475_v60 }
 0x832   :  { %v1567_v9 = vpop.f32.mrb[40].mxu0 }
 0x833   :  { %v1568_v11 = vadd.f32 %v1567_v9, %v2598_v25  ;;  %v2135_v18 = vpop.f32.mrb[41].mxu0 }
 0x834   :  { %v1570_v5 = vpop.f32.mrb[42].mxu0 }
 0x835   :  { %v1589_v58 = vmul.f32 0.1, %v1568_v11  ;;  %v2136_v50 = vpop.f32.mrb[43].mxu0  ;;  %v1602_v45 = vmul.f32 %v2747_v10, %v1568_v11  ;;  %v1796_v10 = vmul.f32 0.00625, %v2765_v7 }
 0x837   :  { %v1590_v13 = vadd.f32 %v1589_v58, %v1588_v16  ;;  %v1797_v46 = vadd.f32 %v1796_v10, %v2765_v7 }
 0x839   :  { %v1599_v60 = vadd.f32 %v1598_v57, %v1590_v13 }
 0x83b   :  { %v1600_v32 = vmul.f32 0.125, %v1599_v60  ;;  %v2149_v33 = vpop.f32.mrb[44].mxu0 }
 0x83c   :  { %v1734_v34 = vadd.f32 %v2149_v33, %v2495_v2  ;;  %v1725_v36 = vpop.f32.mrb[45].mxu0 }
 0x83d   :  { %v1601_v37 = vsub.f32 %v1390_v44, %v1600_v32  ;;  %v1726_v28 = vadd.f32 %v1725_v36, %v2491_v63  ;;  %v2150_v38 = vpop.f32.mrb[46].mxu0  ;;  %v1901_v63 = vld [vmem:[%s2850_s0 + $0x7] ss:$0 sm:$0xff] }
 0x83e   :  { %v1737_v55 = vadd.f32 %v2150_v38, %v2497_v3  ;;  %v1728_v52 = vpop.f32.mrb[47].mxu0  ;;  %v1742_v42 = vmax.f32 %v1734_v34, 0.0  ;;  %v1791_v3 = vmul.f32 0.2, %v2765_v7 }
 0x83f   :  { %v2810_v39 = vadd.f32 %v1602_v45, %v1601_v37  ;;  %v1729_v40 = vadd.f32 %v1728_v52, %v2493_v1  ;;  %v1740_v0 = vmax.f32 %v1726_v28, 0.0  ;;  %v1793_v1 = vmul.f32 %v1901_v63, %v1901_v63 }
 0x840   :  { %v1743_v43 = vmax.f32 %v1737_v55, 0.0  ;;  %v1792_v44 = vmul.f32 0.1, %v1791_v3  ;;  %v1798_v48 = vmul.f32 %v1901_v63, %v1791_v3 }
 0x841   :  { %v1741_v6 = vmax.f32 %v1729_v40, 0.0  ;;  %v1902_v59 = vadd.f32 -0.125, %v1793_v1 }
 0x842   :  { %v1745_v61 = vpack.c.bf16 %v1743_v43, %v1742_v42 }
 0x843   :  { %v1744_v2 = vpack.c.bf16 %v1741_v6, %v1740_v0  ;;  %v1795_v51 = vmul.f32 %v1902_v59, %v1792_v44 }
 0x845   :  { %2152 = vmatpush3.bf16.msra.mxu1 %v1744_v2 }
 0x846   :  { %2153 = vmatprep.subr.bf16.mxu1 %v2223_v62  ;;  %v1799_v62 = vadd.f32 %v1798_v48, %v1797_v46 }
 0x848   :  { %v1800_v49 = vadd.f32 %v1799_v62, %v1795_v51 }
 0x849   :  { %2154 = vmatpush3.bf16.msra.mxu1 %v1745_v61 }
 0x84a   :  { %1817 = vst [vmem:[#allocation2] sm:$0xf] %v1800_v49 }
 0x84c   :  { %2156 = vmatmul.mubr.msk.bf16.vlgmr.msra.gmra.mrb[44].mxu1 %vm189_vm2, %v2518_v47 }
 0x84d   :  { %2185 = shalt.err (!%p2182_p4)
}
 0x84e   :  { %s2186_s3 = scalar_lea.hbm %s2860_s10, 64 }
 0x84f   :  { %p2187_p5 = scmp.ne.s32.totalorder %s2860_s10, %s2186_s3  ;;  %p2190_p6 = scmp.lt.u32.totalorder %s2186_s3, %s2860_s10 }
 0x851   :  { %p2192_p7 = pnand %p2190_p6, %p2187_p5 }
 0x853   :  { %2195 = shalt.err (!%p2192_p7)
}
 0x854   :  { %1828 = dma.vmem_to_hbm [thread:$0]  %s1826_s29, 64, %s2860_s10, [#allocation3]   ;;  %v1804_v47 = vsel %vm312_vm4, %v1800_v49, 0.0  ;;  %v1801_v24 = vmul.f32 0.03, %v2810_v39 }
 0x855   :  { %v1805_v7 = vrot.slane %v1804_v47, 4  ;;  %s2226_s10 = smov [#allocation4]  }
 0x856   :  { %s1835_s17 = sshll.u32 %s2226_s10, 4  ;;  %s1836_s17 = int_to_ptr.vmem [resolvable:$true] %s1835_s17 }
 0x857   :  { %v1806_v56 = vadd.f32 %v1805_v7, %v1804_v47  ;;  %s2196_s18 = scalar_lea.vmem %s1836_s17, 32  ;;  %p2201_p9 = scmp.lt.s32.totalorder %s1836_s17, %s1836_s17 }
 0x858   :  { %p2197_p8 = scmp.ne.s32.totalorder %s1836_s17, %s2196_s18  ;;  %p2202_p10 = scmp.lt.s32.totalorder %s2196_s18, %s2196_s18 }
 0x859   :  { %v1807_v35 = vrot.slane %v1806_v56, 2 }
 0x85a   :  { %p2203_p11 = por %p2202_p10, %p2201_p9 }
 0x85b   :  { %v1808_v54 = vadd.f32 %v1807_v35, %v1806_v56 }
 0x85c   :  { %p2204_p12 = pnand %p2203_p11, %p2197_p8 }
 0x85d   :  { %v1809_v53 = vrot.slane %v1808_v54, 1 }
 0x85f   :  { %v1810_v14 = vadd.f32 %v1809_v53, %v1808_v54 }
 0x861   :  { %v1811_v8 = vmul.f32 0.005, %v1810_v14 }
 0x91f   :  { %v1780_v15 = vpop.f32.mrb[44].mxu1 }
 0x920   :  { %v1781_v20 = vadd.f32 %v1780_v15, %v2598_v25  ;;  %v2157_v21 = vpop.f32.mrb[45].mxu1 }
 0x921   :  { %v1783_v26 = vpop.f32.mrb[46].mxu1 }
 0x922   :  { %v1802_v27 = vmul.f32 0.1, %v1781_v20  ;;  %v2158_v29 = vpop.f32.mrb[47].mxu1  ;;  %v1815_v23 = vmul.f32 %v1901_v63, %v1781_v20 }
 0x924   :  { %v1803_v4 = vadd.f32 %v1802_v27, %v1801_v24 }
 0x926   :  { %v1812_v41 = vadd.f32 %v1811_v8, %v1803_v4 }
 0x928   :  { %v1813_v19 = vmul.f32 0.125, %v1812_v41 }
 0x92a   :  { %v1814_v30 = vsub.f32 %v2810_v39, %v1813_v19 }
 0x92c   :  { %v1816_v17 = vadd.f32 %v1815_v23, %v1814_v30 }
 0x92e   :  { %1818 = vst [vmem:[#allocation4] sm:$0x3] %v1816_v17 }
 0x92f   :  { %2207 = shalt.err (!%p2204_p12)
}
 0x930   :  { %s2208_s20 = scalar_lea.hbm %s2861_s11, 32 }
 0x931   :  { %p2209_p13 = scmp.ne.s32.totalorder %s2861_s11, %s2208_s20  ;;  %p2212_p0 = scmp.lt.u32.totalorder %s2208_s20, %s2861_s11 }
 0x933   :  { %p2214_p1 = pnand %p2212_p0, %p2209_p13 }
 0x935   :  { %2217 = shalt.err (!%p2214_p1)
}
 0x936   :  { %1838 = dma.vmem_to_hbm [thread:$0]  %s1836_s17, 32, %s2861_s11, [#allocation5]  }
 0x937   :  { %2218 = dma.done.wait [#allocation3], 64  }
 0x938   :  { %2219 = vsyncadd [#allocation3], 4294967232 }
 0x939   :  { %2220 = dma.done.wait [#allocation5], 32  }
 0x93a   :  { %2221 = vsyncadd [#allocation5], 4294967264 }
 0x93b   :  { %1845 = vsyncpa [#allocation3], 1 }
 0x93c   :  { %1846 = vsyncpa [#allocation5], 1 }

</bundles_post_ra>
